<compile_context>
chip_gen: v7x
topology: tpu7x:2x2x1
jax: 0.10.0
libtpu: 0.0.40
codegen_flags: <defaults>
</compile_context>

<pallas_src>
import jax
import jax.numpy as jnp
from jax.experimental import pallas as pl
from jax.experimental.pallas import tpu as pltpu


def graphconv_kernel(a_ref, w_ref, b_ref, x_ref, out_ref):
    """a_ref:(S,S) SMEM; w_ref:(D,O); b_ref:(1,O); x_ref:(1,S,LB,D); out_ref:(1,S,LB,O)."""
    _, S, LB, D = x_ref.shape
    O = w_ref.shape[1]

    # Stage 1: dense projection (no bias yet) as ONE (S*LB, D) @ (D, O) MXU matmul.
    x2 = x_ref[...].reshape(S * LB, D)                  # leading-dim merge: free
    z = jnp.dot(x2, w_ref[...], preferred_element_type=jnp.float32)
    z = z.reshape(S, LB, O)                             # leading-dim split: free

    bias = b_ref[...]                                   # (1, O) -> broadcasts over (LB, O)

    # Stage 2: graph mixing over the sensor axis, unrolled on the VPU with the
    # adjacency scalars read from SMEM:  y[s,l,o] = sum_t A[s,t] * z[t,l,o]
    for s in range(S):
        acc = a_ref[s, 0] * z[0]
        for t in range(1, S):
            acc = acc + a_ref[s, t] * z[t]
        out_ref[0, s, :, :] = jnp.maximum(acc + bias, 0.0).astype(out_ref.dtype)


def normalize_adj(adj):
    """D^-1/2 (A + I) D^-1/2, same as GraphConv.normalize_adj (one-time preprocessing)."""
    adj = adj + jnp.eye(adj.shape[0], dtype=adj.dtype)
    d = adj.sum(1)
    d_inv_sqrt = 1.0 / jnp.sqrt(d)
    return d_inv_sqrt[:, None] * adj * d_inv_sqrt[None, :]


def graph_conv_forward(x, a_norm, w, b, *, l_block=256):
    """x: (B, S, L, Din); a_norm: (S, S); w: (Dout, Din) (PyTorch Linear layout); b: (Dout,)."""
    B, S, L, D = x.shape
    O = w.shape[0]

    # Tile the length axis; keep the tile sublane-aligned unless it covers all of L.
    lb = L if L <= l_block else l_block
    if lb != L and lb % 8 != 0:
        lb = max(8, (lb // 8) * 8)
    n_l = pl.cdiv(L, lb)
    # Non-divisible tails are handled by Pallas boundary padding/masking: every
    # output row depends only on the SAME length index of x, so padded rows are
    # never read into valid outputs.

    x_f = x.astype(jnp.float32)
    a_f = a_norm.astype(jnp.float32)
    w_t = jnp.transpose(w).astype(jnp.float32)          # (Din, Dout), row-major for x @ W^T
    b2 = b.reshape(1, O).astype(jnp.float32)

    flops = 2 * B * L * S * O * (D + S)
    bytes_accessed = 4 * (x_f.size + B * S * L * O + S * S + D * O + O)

    out = pl.pallas_call(
        graphconv_kernel,
        out_shape=jax.ShapeDtypeStruct((B, S, L, O), jnp.float32),
        grid=(B, n_l),
        in_specs=[
            pl.BlockSpec(memory_space=pltpu.MemorySpace.SMEM),            # A (scalar table)
            pl.BlockSpec((D, O), lambda bi, li: (0, 0)),                  # W^T (resident)
            pl.BlockSpec((1, O), lambda bi, li: (0, 0)),                  # bias (resident)
            pl.BlockSpec((1, S, lb, D), lambda bi, li: (bi, 0, li, 0)),   # x block, native layout
        ],
        out_specs=pl.BlockSpec((1, S, lb, O), lambda bi, li: (bi, 0, li, 0)),
        compiler_params=pltpu.CompilerParams(
            dimension_semantics=("parallel", "parallel"),
        ),
        cost_estimate=pl.CostEstimate(flops=flops, transcendentals=0,
                                      bytes_accessed=bytes_accessed),
    )(a_f, w_t, b2, x_f)
    return out                                           # (B, S, L, Dout)


def graph_conv_ref(x, a_norm, w, b):
    """Pure-JAX reference with the exact PyTorch semantics."""
    B, S, L, D = x.shape
    xb = jnp.transpose(x, (0, 2, 1, 3)).reshape(B * L, S, D)
    h = jnp.einsum('st,ntd->nsd', a_norm, xb)
    y = jnp.maximum(h @ w.T + b, 0.0)
    y = y.reshape(B, L, S, -1)
    return jnp.transpose(y, (0, 2, 1, 3))                # (B, S, L, Dout)


if __name__ == "__main__":
    # Small shapes consistent with the module: (batch, sensors, length, in_dim)
    B, S, L, DIN, DOUT = 2, 8, 16, 16, 32

    key = jax.random.PRNGKey(0)
    k_x, k_g, k_w, k_b = jax.random.split(key, 4)

    x = jax.random.normal(k_x, (B, S, L, DIN), jnp.float32)

    # deterministic symmetric 0/1 adjacency, normalized like GraphConv.__init__
    a_raw = (jax.random.uniform(k_g, (S, S)) < 0.4).astype(jnp.float32)
    adj = jnp.maximum(a_raw, a_raw.T)
    a_norm = normalize_adj(adj)

    # nn.Linear(in_dim, out_dim)-style init
    bound = 1.0 / jnp.sqrt(jnp.float32(DIN))
    w = jax.random.uniform(k_w, (DOUT, DIN), jnp.float32, -bound, bound)
    b = jax.random.uniform(k_b, (DOUT,), jnp.float32, -bound, bound)

    out = graph_conv_forward(x, a_norm, w, b)
    out = jax.block_until_ready(out)

    ref = graph_conv_ref(x, a_norm, w, b)
    assert out.shape == (B, S, L, DOUT), out.shape
    assert jnp.allclose(out, ref, atol=2e-4, rtol=2e-4), "mismatch vs pure-JAX reference"

    print("KERNEL_OK")
</pallas_src>

<mosaic_0001>
module attributes {stable_mosaic.version = 11 : i64} {
  func.func @graphconv_kernel(%arg0: i32, %arg1: i32, %arg2: memref<8x8xf32, #tpu.memory_space<smem>>, %arg3: memref<16x32xf32, #tpu.memory_space<vmem>>, %arg4: memref<1x32xf32, #tpu.memory_space<vmem>>, %arg5: memref<1x8x16x16xf32, #tpu.memory_space<vmem>>, %arg6: memref<1x8x16x32xf32, #tpu.memory_space<vmem>>) attributes {dimension_semantics = [#tpu.dimension_semantics<parallel>, #tpu.dimension_semantics<parallel>], iteration_bounds = array<i64: 2, 1>, scalar_prefetch = 0 : i64, scratch_operands = 0 : i64, tpu.core_type = #tpu.core_type<tc>, window_params = [{transform_indices = @transform_0, window_bounds = array<i64: 8, 8>}, {pipeline_mode = #tpu.pipeline_mode<synchronous>, transform_indices = @transform_1, window_bounds = array<i64: 16, 32>}, {pipeline_mode = #tpu.pipeline_mode<synchronous>, transform_indices = @transform_2, window_bounds = array<i64: 1, 32>}, {transform_indices = @transform_3, window_bounds = array<i64: 1, 8, 16, 16>}, {transform_indices = @transform_4, window_bounds = array<i64: 1, 8, 16, 32>}]} {
    %c0 = arith.constant 0 : index
    %c0_0 = arith.constant 0 : index
    %c0_1 = arith.constant 0 : index
    %c0_2 = arith.constant 0 : index
    %0 = vector.load %arg5[%c0, %c0_0, %c0_1, %c0_2] : memref<1x8x16x16xf32, #tpu.memory_space<vmem>>, vector<1x8x16x16xf32>
    %1 = vector.shape_cast %0 : vector<1x8x16x16xf32> to vector<128x16xf32>
    %c0_3 = arith.constant 0 : index
    %c0_4 = arith.constant 0 : index
    %2 = vector.load %arg3[%c0_3, %c0_4] : memref<16x32xf32, #tpu.memory_space<vmem>>, vector<16x32xf32>
    %cst = arith.constant dense<0.000000e+00> : vector<128x32xf32>
    %3 = tpu.matmul %1, %2, %cst {dimension_numbers = #tpu.dot_dimension_numbers<[1], [0], [0], [1], [0, 0, 1, 1], [], []>} : vector<128x16xf32>, vector<16x32xf32>, vector<128x32xf32> -> vector<128x32xf32>
    %4 = vector.shape_cast %3 : vector<128x32xf32> to vector<8x16x32xf32>
    %c0_5 = arith.constant 0 : index
    %c0_6 = arith.constant 0 : index
    %5 = vector.load %arg4[%c0_5, %c0_6] : memref<1x32xf32, #tpu.memory_space<vmem>>, vector<1x32xf32>
    %c0_7 = arith.constant 0 : index
    %c0_8 = arith.constant 0 : index
    %6 = memref.load %arg2[%c0_7, %c0_8] : memref<8x8xf32, #tpu.memory_space<smem>>
    %7 = vector.extract_strided_slice %4 {offsets = [0, 0, 0], sizes = [1, 16, 32], strides = [1, 1, 1]} : vector<8x16x32xf32> to vector<1x16x32xf32>
    %8 = vector.shape_cast %7 : vector<1x16x32xf32> to vector<16x32xf32>
    %9 = vector.broadcast %6 : f32 to vector<16x32xf32>
    %10 = arith.mulf %9, %8 : vector<16x32xf32>
    %c0_9 = arith.constant 0 : index
    %c1 = arith.constant 1 : index
    %11 = memref.load %arg2[%c0_9, %c1] : memref<8x8xf32, #tpu.memory_space<smem>>
    %12 = vector.extract_strided_slice %4 {offsets = [1, 0, 0], sizes = [1, 16, 32], strides = [1, 1, 1]} : vector<8x16x32xf32> to vector<1x16x32xf32>
    %13 = vector.shape_cast %12 : vector<1x16x32xf32> to vector<16x32xf32>
    %14 = vector.broadcast %11 : f32 to vector<16x32xf32>
    %15 = arith.mulf %14, %13 : vector<16x32xf32>
    %16 = arith.addf %10, %15 : vector<16x32xf32>
    %c0_10 = arith.constant 0 : index
    %c2 = arith.constant 2 : index
    %17 = memref.load %arg2[%c0_10, %c2] : memref<8x8xf32, #tpu.memory_space<smem>>
    %18 = vector.extract_strided_slice %4 {offsets = [2, 0, 0], sizes = [1, 16, 32], strides = [1, 1, 1]} : vector<8x16x32xf32> to vector<1x16x32xf32>
    %19 = vector.shape_cast %18 : vector<1x16x32xf32> to vector<16x32xf32>
    %20 = vector.broadcast %17 : f32 to vector<16x32xf32>
    %21 = arith.mulf %20, %19 : vector<16x32xf32>
    %22 = arith.addf %16, %21 : vector<16x32xf32>
    %c0_11 = arith.constant 0 : index
    %c3 = arith.constant 3 : index
    %23 = memref.load %arg2[%c0_11, %c3] : memref<8x8xf32, #tpu.memory_space<smem>>
    %24 = vector.extract_strided_slice %4 {offsets = [3, 0, 0], sizes = [1, 16, 32], strides = [1, 1, 1]} : vector<8x16x32xf32> to vector<1x16x32xf32>
    %25 = vector.shape_cast %24 : vector<1x16x32xf32> to vector<16x32xf32>
    %26 = vector.broadcast %23 : f32 to vector<16x32xf32>
    %27 = arith.mulf %26, %25 : vector<16x32xf32>
    %28 = arith.addf %22, %27 : vector<16x32xf32>
    %c0_12 = arith.constant 0 : index
    %c4 = arith.constant 4 : index
    %29 = memref.load %arg2[%c0_12, %c4] : memref<8x8xf32, #tpu.memory_space<smem>>
    %30 = vector.extract_strided_slice %4 {offsets = [4, 0, 0], sizes = [1, 16, 32], strides = [1, 1, 1]} : vector<8x16x32xf32> to vector<1x16x32xf32>
    %31 = vector.shape_cast %30 : vector<1x16x32xf32> to vector<16x32xf32>
    %32 = vector.broadcast %29 : f32 to vector<16x32xf32>
    %33 = arith.mulf %32, %31 : vector<16x32xf32>
    %34 = arith.addf %28, %33 : vector<16x32xf32>
    %c0_13 = arith.constant 0 : index
    %c5 = arith.constant 5 : index
    %35 = memref.load %arg2[%c0_13, %c5] : memref<8x8xf32, #tpu.memory_space<smem>>
    %36 = vector.extract_strided_slice %4 {offsets = [5, 0, 0], sizes = [1, 16, 32], strides = [1, 1, 1]} : vector<8x16x32xf32> to vector<1x16x32xf32>
    %37 = vector.shape_cast %36 : vector<1x16x32xf32> to vector<16x32xf32>
    %38 = vector.broadcast %35 : f32 to vector<16x32xf32>
    %39 = arith.mulf %38, %37 : vector<16x32xf32>
    %40 = arith.addf %34, %39 : vector<16x32xf32>
    %c0_14 = arith.constant 0 : index
    %c6 = arith.constant 6 : index
    %41 = memref.load %arg2[%c0_14, %c6] : memref<8x8xf32, #tpu.memory_space<smem>>
    %42 = vector.extract_strided_slice %4 {offsets = [6, 0, 0], sizes = [1, 16, 32], strides = [1, 1, 1]} : vector<8x16x32xf32> to vector<1x16x32xf32>
    %43 = vector.shape_cast %42 : vector<1x16x32xf32> to vector<16x32xf32>
    %44 = vector.broadcast %41 : f32 to vector<16x32xf32>
    %45 = arith.mulf %44, %43 : vector<16x32xf32>
    %46 = arith.addf %40, %45 : vector<16x32xf32>
    %c0_15 = arith.constant 0 : index
    %c7 = arith.constant 7 : index
    %47 = memref.load %arg2[%c0_15, %c7] : memref<8x8xf32, #tpu.memory_space<smem>>
    %48 = vector.extract_strided_slice %4 {offsets = [7, 0, 0], sizes = [1, 16, 32], strides = [1, 1, 1]} : vector<8x16x32xf32> to vector<1x16x32xf32>
    %49 = vector.shape_cast %48 : vector<1x16x32xf32> to vector<16x32xf32>
    %50 = vector.broadcast %47 : f32 to vector<16x32xf32>
    %51 = arith.mulf %50, %49 : vector<16x32xf32>
    %52 = arith.addf %46, %51 : vector<16x32xf32>
    %53 = vector.broadcast %5 : vector<1x32xf32> to vector<16x32xf32>
    %54 = arith.addf %52, %53 : vector<16x32xf32>
    %cst_16 = arith.constant 0.000000e+00 : f32
    %55 = vector.broadcast %cst_16 : f32 to vector<16x32xf32>
    %56 = arith.maximumf %54, %55 : vector<16x32xf32>
    %c0_17 = arith.constant 0 : index
    %c0_18 = arith.constant 0 : index
    %c0_19 = arith.constant 0 : index
    %c0_20 = arith.constant 0 : index
    %57 = vector.load %arg6[%c0_17, %c0_18, %c0_19, %c0_20] : memref<1x8x16x32xf32, #tpu.memory_space<vmem>>, vector<1x1x16x32xf32>
    %58 = vector.shape_cast %57 : vector<1x1x16x32xf32> to vector<16x32xf32>
    %59 = vector.shape_cast %56 : vector<16x32xf32> to vector<1x1x16x32xf32>
    tpu.vector_store %arg6[%c0_17, %c0_18, %c0_19, %c0_20], %59 {strides = array<i32>} : memref<1x8x16x32xf32, #tpu.memory_space<vmem>>, vector<1x1x16x32xf32>,
    %c1_21 = arith.constant 1 : index
    %c0_22 = arith.constant 0 : index
    %60 = memref.load %arg2[%c1_21, %c0_22] : memref<8x8xf32, #tpu.memory_space<smem>>
    %61 = vector.extract_strided_slice %4 {offsets = [0, 0, 0], sizes = [1, 16, 32], strides = [1, 1, 1]} : vector<8x16x32xf32> to vector<1x16x32xf32>
    %62 = vector.shape_cast %61 : vector<1x16x32xf32> to vector<16x32xf32>
    %63 = vector.broadcast %60 : f32 to vector<16x32xf32>
    %64 = arith.mulf %63, %62 : vector<16x32xf32>
    %c1_23 = arith.constant 1 : index
    %c1_24 = arith.constant 1 : index
    %65 = memref.load %arg2[%c1_23, %c1_24] : memref<8x8xf32, #tpu.memory_space<smem>>
    %66 = vector.extract_strided_slice %4 {offsets = [1, 0, 0], sizes = [1, 16, 32], strides = [1, 1, 1]} : vector<8x16x32xf32> to vector<1x16x32xf32>
    %67 = vector.shape_cast %66 : vector<1x16x32xf32> to vector<16x32xf32>
    %68 = vector.broadcast %65 : f32 to vector<16x32xf32>
    %69 = arith.mulf %68, %67 : vector<16x32xf32>
    %70 = arith.addf %64, %69 : vector<16x32xf32>
    %c1_25 = arith.constant 1 : index
    %c2_26 = arith.constant 2 : index
    %71 = memref.load %arg2[%c1_25, %c2_26] : memref<8x8xf32, #tpu.memory_space<smem>>
    %72 = vector.extract_strided_slice %4 {offsets = [2, 0, 0], sizes = [1, 16, 32], strides = [1, 1, 1]} : vector<8x16x32xf32> to vector<1x16x32xf32>
    %73 = vector.shape_cast %72 : vector<1x16x32xf32> to vector<16x32xf32>
    %74 = vector.broadcast %71 : f32 to vector<16x32xf32>
    %75 = arith.mulf %74, %73 : vector<16x32xf32>
    %76 = arith.addf %70, %75 : vector<16x32xf32>
    %c1_27 = arith.constant 1 : index
    %c3_28 = arith.constant 3 : index
    %77 = memref.load %arg2[%c1_27, %c3_28] : memref<8x8xf32, #tpu.memory_space<smem>>
    %78 = vector.extract_strided_slice %4 {offsets = [3, 0, 0], sizes = [1, 16, 32], strides = [1, 1, 1]} : vector<8x16x32xf32> to vector<1x16x32xf32>
    %79 = vector.shape_cast %78 : vector<1x16x32xf32> to vector<16x32xf32>
    %80 = vector.broadcast %77 : f32 to vector<16x32xf32>
    %81 = arith.mulf %80, %79 : vector<16x32xf32>
    %82 = arith.addf %76, %81 : vector<16x32xf32>
    %c1_29 = arith.constant 1 : index
    %c4_30 = arith.constant 4 : index
    %83 = memref.load %arg2[%c1_29, %c4_30] : memref<8x8xf32, #tpu.memory_space<smem>>
    %84 = vector.extract_strided_slice %4 {offsets = [4, 0, 0], sizes = [1, 16, 32], strides = [1, 1, 1]} : vector<8x16x32xf32> to vector<1x16x32xf32>
    %85 = vector.shape_cast %84 : vector<1x16x32xf32> to vector<16x32xf32>
    %86 = vector.broadcast %83 : f32 to vector<16x32xf32>
    %87 = arith.mulf %86, %85 : vector<16x32xf32>
    %88 = arith.addf %82, %87 : vector<16x32xf32>
    %c1_31 = arith.constant 1 : index
    %c5_32 = arith.constant 5 : index
    %89 = memref.load %arg2[%c1_31, %c5_32] : memref<8x8xf32, #tpu.memory_space<smem>>
    %90 = vector.extract_strided_slice %4 {offsets = [5, 0, 0], sizes = [1, 16, 32], strides = [1, 1, 1]} : vector<8x16x32xf32> to vector<1x16x32xf32>
    %91 = vector.shape_cast %90 : vector<1x16x32xf32> to vector<16x32xf32>
    %92 = vector.broadcast %89 : f32 to vector<16x32xf32>
    %93 = arith.mulf %92, %91 : vector<16x32xf32>
    %94 = arith.addf %88, %93 : vector<16x32xf32>
    %c1_33 = arith.constant 1 : index
    %c6_34 = arith.constant 6 : index
    %95 = memref.load %arg2[%c1_33, %c6_34] : memref<8x8xf32, #tpu.memory_space<smem>>
    %96 = vector.extract_strided_slice %4 {offsets = [6, 0, 0], sizes = [1, 16, 32], strides = [1, 1, 1]} : vector<8x16x32xf32> to vector<1x16x32xf32>
    %97 = vector.shape_cast %96 : vector<1x16x32xf32> to vector<16x32xf32>
    %98 = vector.broadcast %95 : f32 to vector<16x32xf32>
    %99 = arith.mulf %98, %97 : vector<16x32xf32>
    %100 = arith.addf %94, %99 : vector<16x32xf32>
    %c1_35 = arith.constant 1 : index
    %c7_36 = arith.constant 7 : index
    %101 = memref.load %arg2[%c1_35, %c7_36] : memref<8x8xf32, #tpu.memory_space<smem>>
    %102 = vector.extract_strided_slice %4 {offsets = [7, 0, 0], sizes = [1, 16, 32], strides = [1, 1, 1]} : vector<8x16x32xf32> to vector<1x16x32xf32>
    %103 = vector.shape_cast %102 : vector<1x16x32xf32> to vector<16x32xf32>
    %104 = vector.broadcast %101 : f32 to vector<16x32xf32>
    %105 = arith.mulf %104, %103 : vector<16x32xf32>
    %106 = arith.addf %100, %105 : vector<16x32xf32>
    %107 = vector.broadcast %5 : vector<1x32xf32> to vector<16x32xf32>
    %108 = arith.addf %106, %107 : vector<16x32xf32>
    %cst_37 = arith.constant 0.000000e+00 : f32
    %109 = vector.broadcast %cst_37 : f32 to vector<16x32xf32>
    %110 = arith.maximumf %108, %109 : vector<16x32xf32>
    %c0_38 = arith.constant 0 : index
    %c1_39 = arith.constant 1 : index
    %c0_40 = arith.constant 0 : index
    %c0_41 = arith.constant 0 : index
    %111 = vector.load %arg6[%c0_38, %c1_39, %c0_40, %c0_41] : memref<1x8x16x32xf32, #tpu.memory_space<vmem>>, vector<1x1x16x32xf32>
    %112 = vector.shape_cast %111 : vector<1x1x16x32xf32> to vector<16x32xf32>
    %113 = vector.shape_cast %110 : vector<16x32xf32> to vector<1x1x16x32xf32>
    tpu.vector_store %arg6[%c0_38, %c1_39, %c0_40, %c0_41], %113 {strides = array<i32>} : memref<1x8x16x32xf32, #tpu.memory_space<vmem>>, vector<1x1x16x32xf32>,
    %c2_42 = arith.constant 2 : index
    %c0_43 = arith.constant 0 : index
    %114 = memref.load %arg2[%c2_42, %c0_43] : memref<8x8xf32, #tpu.memory_space<smem>>
    %115 = vector.extract_strided_slice %4 {offsets = [0, 0, 0], sizes = [1, 16, 32], strides = [1, 1, 1]} : vector<8x16x32xf32> to vector<1x16x32xf32>
    %116 = vector.shape_cast %115 : vector<1x16x32xf32> to vector<16x32xf32>
    %117 = vector.broadcast %114 : f32 to vector<16x32xf32>
    %118 = arith.mulf %117, %116 : vector<16x32xf32>
    %c2_44 = arith.constant 2 : index
    %c1_45 = arith.constant 1 : index
    %119 = memref.load %arg2[%c2_44, %c1_45] : memref<8x8xf32, #tpu.memory_space<smem>>
    %120 = vector.extract_strided_slice %4 {offsets = [1, 0, 0], sizes = [1, 16, 32], strides = [1, 1, 1]} : vector<8x16x32xf32> to vector<1x16x32xf32>
    %121 = vector.shape_cast %120 : vector<1x16x32xf32> to vector<16x32xf32>
    %122 = vector.broadcast %119 : f32 to vector<16x32xf32>
    %123 = arith.mulf %122, %121 : vector<16x32xf32>
    %124 = arith.addf %118, %123 : vector<16x32xf32>
    %c2_46 = arith.constant 2 : index
    %c2_47 = arith.constant 2 : index
    %125 = memref.load %arg2[%c2_46, %c2_47] : memref<8x8xf32, #tpu.memory_space<smem>>
    %126 = vector.extract_strided_slice %4 {offsets = [2, 0, 0], sizes = [1, 16, 32], strides = [1, 1, 1]} : vector<8x16x32xf32> to vector<1x16x32xf32>
    %127 = vector.shape_cast %126 : vector<1x16x32xf32> to vector<16x32xf32>
    %128 = vector.broadcast %125 : f32 to vector<16x32xf32>
    %129 = arith.mulf %128, %127 : vector<16x32xf32>
    %130 = arith.addf %124, %129 : vector<16x32xf32>
    %c2_48 = arith.constant 2 : index
    %c3_49 = arith.constant 3 : index
    %131 = memref.load %arg2[%c2_48, %c3_49] : memref<8x8xf32, #tpu.memory_space<smem>>
    %132 = vector.extract_strided_slice %4 {offsets = [3, 0, 0], sizes = [1, 16, 32], strides = [1, 1, 1]} : vector<8x16x32xf32> to vector<1x16x32xf32>
    %133 = vector.shape_cast %132 : vector<1x16x32xf32> to vector<16x32xf32>
    %134 = vector.broadcast %131 : f32 to vector<16x32xf32>
    %135 = arith.mulf %134, %133 : vector<16x32xf32>
    %136 = arith.addf %130, %135 : vector<16x32xf32>
    %c2_50 = arith.constant 2 : index
    %c4_51 = arith.constant 4 : index
    %137 = memref.load %arg2[%c2_50, %c4_51] : memref<8x8xf32, #tpu.memory_space<smem>>
    %138 = vector.extract_strided_slice %4 {offsets = [4, 0, 0], sizes = [1, 16, 32], strides = [1, 1, 1]} : vector<8x16x32xf32> to vector<1x16x32xf32>
    %139 = vector.shape_cast %138 : vector<1x16x32xf32> to vector<16x32xf32>
    %140 = vector.broadcast %137 : f32 to vector<16x32xf32>
    %141 = arith.mulf %140, %139 : vector<16x32xf32>
    %142 = arith.addf %136, %141 : vector<16x32xf32>
    %c2_52 = arith.constant 2 : index
    %c5_53 = arith.constant 5 : index
    %143 = memref.load %arg2[%c2_52, %c5_53] : memref<8x8xf32, #tpu.memory_space<smem>>
    %144 = vector.extract_strided_slice %4 {offsets = [5, 0, 0], sizes = [1, 16, 32], strides = [1, 1, 1]} : vector<8x16x32xf32> to vector<1x16x32xf32>
    %145 = vector.shape_cast %144 : vector<1x16x32xf32> to vector<16x32xf32>
    %146 = vector.broadcast %143 : f32 to vector<16x32xf32>
    %147 = arith.mulf %146, %145 : vector<16x32xf32>
    %148 = arith.addf %142, %147 : vector<16x32xf32>
    %c2_54 = arith.constant 2 : index
    %c6_55 = arith.constant 6 : index
    %149 = memref.load %arg2[%c2_54, %c6_55] : memref<8x8xf32, #tpu.memory_space<smem>>
    %150 = vector.extract_strided_slice %4 {offsets = [6, 0, 0], sizes = [1, 16, 32], strides = [1, 1, 1]} : vector<8x16x32xf32> to vector<1x16x32xf32>
    %151 = vector.shape_cast %150 : vector<1x16x32xf32> to vector<16x32xf32>
    %152 = vector.broadcast %149 : f32 to vector<16x32xf32>
    %153 = arith.mulf %152, %151 : vector<16x32xf32>
    %154 = arith.addf %148, %153 : vector<16x32xf32>
    %c2_56 = arith.constant 2 : index
    %c7_57 = arith.constant 7 : index
    %155 = memref.load %arg2[%c2_56, %c7_57] : memref<8x8xf32, #tpu.memory_space<smem>>
    %156 = vector.extract_strided_slice %4 {offsets = [7, 0, 0], sizes = [1, 16, 32], strides = [1, 1, 1]} : vector<8x16x32xf32> to vector<1x16x32xf32>
    %157 = vector.shape_cast %156 : vector<1x16x32xf32> to vector<16x32xf32>
    %158 = vector.broadcast %155 : f32 to vector<16x32xf32>
    %159 = arith.mulf %158, %157 : vector<16x32xf32>
    %160 = arith.addf %154, %159 : vector<16x32xf32>
    %161 = vector.broadcast %5 : vector<1x32xf32> to vector<16x32xf32>
    %162 = arith.addf %160, %161 : vector<16x32xf32>
    %cst_58 = arith.constant 0.000000e+00 : f32
    %163 = vector.broadcast %cst_58 : f32 to vector<16x32xf32>
    %164 = arith.maximumf %162, %163 : vector<16x32xf32>
    %c0_59 = arith.constant 0 : index
    %c2_60 = arith.constant 2 : index
    %c0_61 = arith.constant 0 : index
    %c0_62 = arith.constant 0 : index
    %165 = vector.load %arg6[%c0_59, %c2_60, %c0_61, %c0_62] : memref<1x8x16x32xf32, #tpu.memory_space<vmem>>, vector<1x1x16x32xf32>
    %166 = vector.shape_cast %165 : vector<1x1x16x32xf32> to vector<16x32xf32>
    %167 = vector.shape_cast %164 : vector<16x32xf32> to vector<1x1x16x32xf32>
    tpu.vector_store %arg6[%c0_59, %c2_60, %c0_61, %c0_62], %167 {strides = array<i32>} : memref<1x8x16x32xf32, #tpu.memory_space<vmem>>, vector<1x1x16x32xf32>,
    %c3_63 = arith.constant 3 : index
    %c0_64 = arith.constant 0 : index
    %168 = memref.load %arg2[%c3_63, %c0_64] : memref<8x8xf32, #tpu.memory_space<smem>>
    %169 = vector.extract_strided_slice %4 {offsets = [0, 0, 0], sizes = [1, 16, 32], strides = [1, 1, 1]} : vector<8x16x32xf32> to vector<1x16x32xf32>
    %170 = vector.shape_cast %169 : vector<1x16x32xf32> to vector<16x32xf32>
    %171 = vector.broadcast %168 : f32 to vector<16x32xf32>
    %172 = arith.mulf %171, %170 : vector<16x32xf32>
    %c3_65 = arith.constant 3 : index
    %c1_66 = arith.constant 1 : index
    %173 = memref.load %arg2[%c3_65, %c1_66] : memref<8x8xf32, #tpu.memory_space<smem>>
    %174 = vector.extract_strided_slice %4 {offsets = [1, 0, 0], sizes = [1, 16, 32], strides = [1, 1, 1]} : vector<8x16x32xf32> to vector<1x16x32xf32>
    %175 = vector.shape_cast %174 : vector<1x16x32xf32> to vector<16x32xf32>
    %176 = vector.broadcast %173 : f32 to vector<16x32xf32>
    %177 = arith.mulf %176, %175 : vector<16x32xf32>
    %178 = arith.addf %172, %177 : vector<16x32xf32>
    %c3_67 = arith.constant 3 : index
    %c2_68 = arith.constant 2 : index
    %179 = memref.load %arg2[%c3_67, %c2_68] : memref<8x8xf32, #tpu.memory_space<smem>>
    %180 = vector.extract_strided_slice %4 {offsets = [2, 0, 0], sizes = [1, 16, 32], strides = [1, 1, 1]} : vector<8x16x32xf32> to vector<1x16x32xf32>
    %181 = vector.shape_cast %180 : vector<1x16x32xf32> to vector<16x32xf32>
    %182 = vector.broadcast %179 : f32 to vector<16x32xf32>
    %183 = arith.mulf %182, %181 : vector<16x32xf32>
    %184 = arith.addf %178, %183 : vector<16x32xf32>
    %c3_69 = arith.constant 3 : index
    %c3_70 = arith.constant 3 : index
    %185 = memref.load %arg2[%c3_69, %c3_70] : memref<8x8xf32, #tpu.memory_space<smem>>
    %186 = vector.extract_strided_slice %4 {offsets = [3, 0, 0], sizes = [1, 16, 32], strides = [1, 1, 1]} : vector<8x16x32xf32> to vector<1x16x32xf32>
    %187 = vector.shape_cast %186 : vector<1x16x32xf32> to vector<16x32xf32>
    %188 = vector.broadcast %185 : f32 to vector<16x32xf32>
    %189 = arith.mulf %188, %187 : vector<16x32xf32>
    %190 = arith.addf %184, %189 : vector<16x32xf32>
    %c3_71 = arith.constant 3 : index
    %c4_72 = arith.constant 4 : index
    %191 = memref.load %arg2[%c3_71, %c4_72] : memref<8x8xf32, #tpu.memory_space<smem>>
    %192 = vector.extract_strided_slice %4 {offsets = [4, 0, 0], sizes = [1, 16, 32], strides = [1, 1, 1]} : vector<8x16x32xf32> to vector<1x16x32xf32>
    %193 = vector.shape_cast %192 : vector<1x16x32xf32> to vector<16x32xf32>
    %194 = vector.broadcast %191 : f32 to vector<16x32xf32>
    %195 = arith.mulf %194, %193 : vector<16x32xf32>
    %196 = arith.addf %190, %195 : vector<16x32xf32>
    %c3_73 = arith.constant 3 : index
    %c5_74 = arith.constant 5 : index
    %197 = memref.load %arg2[%c3_73, %c5_74] : memref<8x8xf32, #tpu.memory_space<smem>>
    %198 = vector.extract_strided_slice %4 {offsets = [5, 0, 0], sizes = [1, 16, 32], strides = [1, 1, 1]} : vector<8x16x32xf32> to vector<1x16x32xf32>
    %199 = vector.shape_cast %198 : vector<1x16x32xf32> to vector<16x32xf32>
    %200 = vector.broadcast %197 : f32 to vector<16x32xf32>
    %201 = arith.mulf %200, %199 : vector<16x32xf32>
    %202 = arith.addf %196, %201 : vector<16x32xf32>
    %c3_75 = arith.constant 3 : index
    %c6_76 = arith.constant 6 : index
    %203 = memref.load %arg2[%c3_75, %c6_76] : memref<8x8xf32, #tpu.memory_space<smem>>
    %204 = vector.extract_strided_slice %4 {offsets = [6, 0, 0], sizes = [1, 16, 32], strides = [1, 1, 1]} : vector<8x16x32xf32> to vector<1x16x32xf32>
    %205 = vector.shape_cast %204 : vector<1x16x32xf32> to vector<16x32xf32>
    %206 = vector.broadcast %203 : f32 to vector<16x32xf32>
    %207 = arith.mulf %206, %205 : vector<16x32xf32>
    %208 = arith.addf %202, %207 : vector<16x32xf32>
    %c3_77 = arith.constant 3 : index
    %c7_78 = arith.constant 7 : index
    %209 = memref.load %arg2[%c3_77, %c7_78] : memref<8x8xf32, #tpu.memory_space<smem>>
    %210 = vector.extract_strided_slice %4 {offsets = [7, 0, 0], sizes = [1, 16, 32], strides = [1, 1, 1]} : vector<8x16x32xf32> to vector<1x16x32xf32>
    %211 = vector.shape_cast %210 : vector<1x16x32xf32> to vector<16x32xf32>
    %212 = vector.broadcast %209 : f32 to vector<16x32xf32>
    %213 = arith.mulf %212, %211 : vector<16x32xf32>
    %214 = arith.addf %208, %213 : vector<16x32xf32>
    %215 = vector.broadcast %5 : vector<1x32xf32> to vector<16x32xf32>
    %216 = arith.addf %214, %215 : vector<16x32xf32>
    %cst_79 = arith.constant 0.000000e+00 : f32
    %217 = vector.broadcast %cst_79 : f32 to vector<16x32xf32>
    %218 = arith.maximumf %216, %217 : vector<16x32xf32>
    %c0_80 = arith.constant 0 : index
    %c3_81 = arith.constant 3 : index
    %c0_82 = arith.constant 0 : index
    %c0_83 = arith.constant 0 : index
    %219 = vector.load %arg6[%c0_80, %c3_81, %c0_82, %c0_83] : memref<1x8x16x32xf32, #tpu.memory_space<vmem>>, vector<1x1x16x32xf32>
    %220 = vector.shape_cast %219 : vector<1x1x16x32xf32> to vector<16x32xf32>
    %221 = vector.shape_cast %218 : vector<16x32xf32> to vector<1x1x16x32xf32>
    tpu.vector_store %arg6[%c0_80, %c3_81, %c0_82, %c0_83], %221 {strides = array<i32>} : memref<1x8x16x32xf32, #tpu.memory_space<vmem>>, vector<1x1x16x32xf32>,
    %c4_84 = arith.constant 4 : index
    %c0_85 = arith.constant 0 : index
    %222 = memref.load %arg2[%c4_84, %c0_85] : memref<8x8xf32, #tpu.memory_space<smem>>
    %223 = vector.extract_strided_slice %4 {offsets = [0, 0, 0], sizes = [1, 16, 32], strides = [1, 1, 1]} : vector<8x16x32xf32> to vector<1x16x32xf32>
    %224 = vector.shape_cast %223 : vector<1x16x32xf32> to vector<16x32xf32>
    %225 = vector.broadcast %222 : f32 to vector<16x32xf32>
    %226 = arith.mulf %225, %224 : vector<16x32xf32>
    %c4_86 = arith.constant 4 : index
    %c1_87 = arith.constant 1 : index
    %227 = memref.load %arg2[%c4_86, %c1_87] : memref<8x8xf32, #tpu.memory_space<smem>>
    %228 = vector.extract_strided_slice %4 {offsets = [1, 0, 0], sizes = [1, 16, 32], strides = [1, 1, 1]} : vector<8x16x32xf32> to vector<1x16x32xf32>
    %229 = vector.shape_cast %228 : vector<1x16x32xf32> to vector<16x32xf32>
    %230 = vector.broadcast %227 : f32 to vector<16x32xf32>
    %231 = arith.mulf %230, %229 : vector<16x32xf32>
    %232 = arith.addf %226, %231 : vector<16x32xf32>
    %c4_88 = arith.constant 4 : index
    %c2_89 = arith.constant 2 : index
    %233 = memref.load %arg2[%c4_88, %c2_89] : memref<8x8xf32, #tpu.memory_space<smem>>
    %234 = vector.extract_strided_slice %4 {offsets = [2, 0, 0], sizes = [1, 16, 32], strides = [1, 1, 1]} : vector<8x16x32xf32> to vector<1x16x32xf32>
    %235 = vector.shape_cast %234 : vector<1x16x32xf32> to vector<16x32xf32>
    %236 = vector.broadcast %233 : f32 to vector<16x32xf32>
    %237 = arith.mulf %236, %235 : vector<16x32xf32>
    %238 = arith.addf %232, %237 : vector<16x32xf32>
    %c4_90 = arith.constant 4 : index
    %c3_91 = arith.constant 3 : index
    %239 = memref.load %arg2[%c4_90, %c3_91] : memref<8x8xf32, #tpu.memory_space<smem>>
    %240 = vector.extract_strided_slice %4 {offsets = [3, 0, 0], sizes = [1, 16, 32], strides = [1, 1, 1]} : vector<8x16x32xf32> to vector<1x16x32xf32>
    %241 = vector.shape_cast %240 : vector<1x16x32xf32> to vector<16x32xf32>
    %242 = vector.broadcast %239 : f32 to vector<16x32xf32>
    %243 = arith.mulf %242, %241 : vector<16x32xf32>
    %244 = arith.addf %238, %243 : vector<16x32xf32>
    %c4_92 = arith.constant 4 : index
    %c4_93 = arith.constant 4 : index
    %245 = memref.load %arg2[%c4_92, %c4_93] : memref<8x8xf32, #tpu.memory_space<smem>>
    %246 = vector.extract_strided_slice %4 {offsets = [4, 0, 0], sizes = [1, 16, 32], strides = [1, 1, 1]} : vector<8x16x32xf32> to vector<1x16x32xf32>
    %247 = vector.shape_cast %246 : vector<1x16x32xf32> to vector<16x32xf32>
    %248 = vector.broadcast %245 : f32 to vector<16x32xf32>
    %249 = arith.mulf %248, %247 : vector<16x32xf32>
    %250 = arith.addf %244, %249 : vector<16x32xf32>
    %c4_94 = arith.constant 4 : index
    %c5_95 = arith.constant 5 : index
    %251 = memref.load %arg2[%c4_94, %c5_95] : memref<8x8xf32, #tpu.memory_space<smem>>
    %252 = vector.extract_strided_slice %4 {offsets = [5, 0, 0], sizes = [1, 16, 32], strides = [1, 1, 1]} : vector<8x16x32xf32> to vector<1x16x32xf32>
    %253 = vector.shape_cast %252 : vector<1x16x32xf32> to vector<16x32xf32>
    %254 = vector.broadcast %251 : f32 to vector<16x32xf32>
    %255 = arith.mulf %254, %253 : vector<16x32xf32>
    %256 = arith.addf %250, %255 : vector<16x32xf32>
    %c4_96 = arith.constant 4 : index
    %c6_97 = arith.constant 6 : index
    %257 = memref.load %arg2[%c4_96, %c6_97] : memref<8x8xf32, #tpu.memory_space<smem>>
    %258 = vector.extract_strided_slice %4 {offsets = [6, 0, 0], sizes = [1, 16, 32], strides = [1, 1, 1]} : vector<8x16x32xf32> to vector<1x16x32xf32>
    %259 = vector.shape_cast %258 : vector<1x16x32xf32> to vector<16x32xf32>
    %260 = vector.broadcast %257 : f32 to vector<16x32xf32>
    %261 = arith.mulf %260, %259 : vector<16x32xf32>
    %262 = arith.addf %256, %261 : vector<16x32xf32>
    %c4_98 = arith.constant 4 : index
    %c7_99 = arith.constant 7 : index
    %263 = memref.load %arg2[%c4_98, %c7_99] : memref<8x8xf32, #tpu.memory_space<smem>>
    %264 = vector.extract_strided_slice %4 {offsets = [7, 0, 0], sizes = [1, 16, 32], strides = [1, 1, 1]} : vector<8x16x32xf32> to vector<1x16x32xf32>
    %265 = vector.shape_cast %264 : vector<1x16x32xf32> to vector<16x32xf32>
    %266 = vector.broadcast %263 : f32 to vector<16x32xf32>
    %267 = arith.mulf %266, %265 : vector<16x32xf32>
    %268 = arith.addf %262, %267 : vector<16x32xf32>
    %269 = vector.broadcast %5 : vector<1x32xf32> to vector<16x32xf32>
    %270 = arith.addf %268, %269 : vector<16x32xf32>
    %cst_100 = arith.constant 0.000000e+00 : f32
    %271 = vector.broadcast %cst_100 : f32 to vector<16x32xf32>
    %272 = arith.maximumf %270, %271 : vector<16x32xf32>
    %c0_101 = arith.constant 0 : index
    %c4_102 = arith.constant 4 : index
    %c0_103 = arith.constant 0 : index
    %c0_104 = arith.constant 0 : index
    %273 = vector.load %arg6[%c0_101, %c4_102, %c0_103, %c0_104] : memref<1x8x16x32xf32, #tpu.memory_space<vmem>>, vector<1x1x16x32xf32>
    %274 = vector.shape_cast %273 : vector<1x1x16x32xf32> to vector<16x32xf32>
    %275 = vector.shape_cast %272 : vector<16x32xf32> to vector<1x1x16x32xf32>
    tpu.vector_store %arg6[%c0_101, %c4_102, %c0_103, %c0_104], %275 {strides = array<i32>} : memref<1x8x16x32xf32, #tpu.memory_space<vmem>>, vector<1x1x16x32xf32>,
    %c5_105 = arith.constant 5 : index
    %c0_106 = arith.constant 0 : index
    %276 = memref.load %arg2[%c5_105, %c0_106] : memref<8x8xf32, #tpu.memory_space<smem>>
    %277 = vector.extract_strided_slice %4 {offsets = [0, 0, 0], sizes = [1, 16, 32], strides = [1, 1, 1]} : vector<8x16x32xf32> to vector<1x16x32xf32>
    %278 = vector.shape_cast %277 : vector<1x16x32xf32> to vector<16x32xf32>
    %279 = vector.broadcast %276 : f32 to vector<16x32xf32>
    %280 = arith.mulf %279, %278 : vector<16x32xf32>
    %c5_107 = arith.constant 5 : index
    %c1_108 = arith.constant 1 : index
    %281 = memref.load %arg2[%c5_107, %c1_108] : memref<8x8xf32, #tpu.memory_space<smem>>
    %282 = vector.extract_strided_slice %4 {offsets = [1, 0, 0], sizes = [1, 16, 32], strides = [1, 1, 1]} : vector<8x16x32xf32> to vector<1x16x32xf32>
    %283 = vector.shape_cast %282 : vector<1x16x32xf32> to vector<16x32xf32>
    %284 = vector.broadcast %281 : f32 to vector<16x32xf32>
    %285 = arith.mulf %284, %283 : vector<16x32xf32>
    %286 = arith.addf %280, %285 : vector<16x32xf32>
    %c5_109 = arith.constant 5 : index
    %c2_110 = arith.constant 2 : index
    %287 = memref.load %arg2[%c5_109, %c2_110] : memref<8x8xf32, #tpu.memory_space<smem>>
    %288 = vector.extract_strided_slice %4 {offsets = [2, 0, 0], sizes = [1, 16, 32], strides = [1, 1, 1]} : vector<8x16x32xf32> to vector<1x16x32xf32>
    %289 = vector.shape_cast %288 : vector<1x16x32xf32> to vector<16x32xf32>
    %290 = vector.broadcast %287 : f32 to vector<16x32xf32>
    %291 = arith.mulf %290, %289 : vector<16x32xf32>
    %292 = arith.addf %286, %291 : vector<16x32xf32>
    %c5_111 = arith.constant 5 : index
    %c3_112 = arith.constant 3 : index
    %293 = memref.load %arg2[%c5_111, %c3_112] : memref<8x8xf32, #tpu.memory_space<smem>>
    %294 = vector.extract_strided_slice %4 {offsets = [3, 0, 0], sizes = [1, 16, 32], strides = [1, 1, 1]} : vector<8x16x32xf32> to vector<1x16x32xf32>
    %295 = vector.shape_cast %294 : vector<1x16x32xf32> to vector<16x32xf32>
    %296 = vector.broadcast %293 : f32 to vector<16x32xf32>
    %297 = arith.mulf %296, %295 : vector<16x32xf32>
    %298 = arith.addf %292, %297 : vector<16x32xf32>
    %c5_113 = arith.constant 5 : index
    %c4_114 = arith.constant 4 : index
    %299 = memref.load %arg2[%c5_113, %c4_114] : memref<8x8xf32, #tpu.memory_space<smem>>
    %300 = vector.extract_strided_slice %4 {offsets = [4, 0, 0], sizes = [1, 16, 32], strides = [1, 1, 1]} : vector<8x16x32xf32> to vector<1x16x32xf32>
    %301 = vector.shape_cast %300 : vector<1x16x32xf32> to vector<16x32xf32>
    %302 = vector.broadcast %299 : f32 to vector<16x32xf32>
    %303 = arith.mulf %302, %301 : vector<16x32xf32>
    %304 = arith.addf %298, %303 : vector<16x32xf32>
    %c5_115 = arith.constant 5 : index
    %c5_116 = arith.constant 5 : index
    %305 = memref.load %arg2[%c5_115, %c5_116] : memref<8x8xf32, #tpu.memory_space<smem>>
    %306 = vector.extract_strided_slice %4 {offsets = [5, 0, 0], sizes = [1, 16, 32], strides = [1, 1, 1]} : vector<8x16x32xf32> to vector<1x16x32xf32>
    %307 = vector.shape_cast %306 : vector<1x16x32xf32> to vector<16x32xf32>
    %308 = vector.broadcast %305 : f32 to vector<16x32xf32>
    %309 = arith.mulf %308, %307 : vector<16x32xf32>
    %310 = arith.addf %304, %309 : vector<16x32xf32>
    %c5_117 = arith.constant 5 : index
    %c6_118 = arith.constant 6 : index
    %311 = memref.load %arg2[%c5_117, %c6_118] : memref<8x8xf32, #tpu.memory_space<smem>>
    %312 = vector.extract_strided_slice %4 {offsets = [6, 0, 0], sizes = [1, 16, 32], strides = [1, 1, 1]} : vector<8x16x32xf32> to vector<1x16x32xf32>
    %313 = vector.shape_cast %312 : vector<1x16x32xf32> to vector<16x32xf32>
    %314 = vector.broadcast %311 : f32 to vector<16x32xf32>
    %315 = arith.mulf %314, %313 : vector<16x32xf32>
    %316 = arith.addf %310, %315 : vector<16x32xf32>
    %c5_119 = arith.constant 5 : index
    %c7_120 = arith.constant 7 : index
    %317 = memref.load %arg2[%c5_119, %c7_120] : memref<8x8xf32, #tpu.memory_space<smem>>
    %318 = vector.extract_strided_slice %4 {offsets = [7, 0, 0], sizes = [1, 16, 32], strides = [1, 1, 1]} : vector<8x16x32xf32> to vector<1x16x32xf32>
    %319 = vector.shape_cast %318 : vector<1x16x32xf32> to vector<16x32xf32>
    %320 = vector.broadcast %317 : f32 to vector<16x32xf32>
    %321 = arith.mulf %320, %319 : vector<16x32xf32>
    %322 = arith.addf %316, %321 : vector<16x32xf32>
    %323 = vector.broadcast %5 : vector<1x32xf32> to vector<16x32xf32>
    %324 = arith.addf %322, %323 : vector<16x32xf32>
    %cst_121 = arith.constant 0.000000e+00 : f32
    %325 = vector.broadcast %cst_121 : f32 to vector<16x32xf32>
    %326 = arith.maximumf %324, %325 : vector<16x32xf32>
    %c0_122 = arith.constant 0 : index
    %c5_123 = arith.constant 5 : index
    %c0_124 = arith.constant 0 : index
    %c0_125 = arith.constant 0 : index
    %327 = vector.load %arg6[%c0_122, %c5_123, %c0_124, %c0_125] : memref<1x8x16x32xf32, #tpu.memory_space<vmem>>, vector<1x1x16x32xf32>
    %328 = vector.shape_cast %327 : vector<1x1x16x32xf32> to vector<16x32xf32>
    %329 = vector.shape_cast %326 : vector<16x32xf32> to vector<1x1x16x32xf32>
    tpu.vector_store %arg6[%c0_122, %c5_123, %c0_124, %c0_125], %329 {strides = array<i32>} : memref<1x8x16x32xf32, #tpu.memory_space<vmem>>, vector<1x1x16x32xf32>,
    %c6_126 = arith.constant 6 : index
    %c0_127 = arith.constant 0 : index
    %330 = memref.load %arg2[%c6_126, %c0_127] : memref<8x8xf32, #tpu.memory_space<smem>>
    %331 = vector.extract_strided_slice %4 {offsets = [0, 0, 0], sizes = [1, 16, 32], strides = [1, 1, 1]} : vector<8x16x32xf32> to vector<1x16x32xf32>
    %332 = vector.shape_cast %331 : vector<1x16x32xf32> to vector<16x32xf32>
    %333 = vector.broadcast %330 : f32 to vector<16x32xf32>
    %334 = arith.mulf %333, %332 : vector<16x32xf32>
    %c6_128 = arith.constant 6 : index
    %c1_129 = arith.constant 1 : index
    %335 = memref.load %arg2[%c6_128, %c1_129] : memref<8x8xf32, #tpu.memory_space<smem>>
    %336 = vector.extract_strided_slice %4 {offsets = [1, 0, 0], sizes = [1, 16, 32], strides = [1, 1, 1]} : vector<8x16x32xf32> to vector<1x16x32xf32>
    %337 = vector.shape_cast %336 : vector<1x16x32xf32> to vector<16x32xf32>
    %338 = vector.broadcast %335 : f32 to vector<16x32xf32>
    %339 = arith.mulf %338, %337 : vector<16x32xf32>
    %340 = arith.addf %334, %339 : vector<16x32xf32>
    %c6_130 = arith.constant 6 : index
    %c2_131 = arith.constant 2 : index
    %341 = memref.load %arg2[%c6_130, %c2_131] : memref<8x8xf32, #tpu.memory_space<smem>>
    %342 = vector.extract_strided_slice %4 {offsets = [2, 0, 0], sizes = [1, 16, 32], strides = [1, 1, 1]} : vector<8x16x32xf32> to vector<1x16x32xf32>
    %343 = vector.shape_cast %342 : vector<1x16x32xf32> to vector<16x32xf32>
    %344 = vector.broadcast %341 : f32 to vector<16x32xf32>
    %345 = arith.mulf %344, %343 : vector<16x32xf32>
    %346 = arith.addf %340, %345 : vector<16x32xf32>
    %c6_132 = arith.constant 6 : index
    %c3_133 = arith.constant 3 : index
    %347 = memref.load %arg2[%c6_132, %c3_133] : memref<8x8xf32, #tpu.memory_space<smem>>
    %348 = vector.extract_strided_slice %4 {offsets = [3, 0, 0], sizes = [1, 16, 32], strides = [1, 1, 1]} : vector<8x16x32xf32> to vector<1x16x32xf32>
    %349 = vector.shape_cast %348 : vector<1x16x32xf32> to vector<16x32xf32>
    %350 = vector.broadcast %347 : f32 to vector<16x32xf32>
    %351 = arith.mulf %350, %349 : vector<16x32xf32>
    %352 = arith.addf %346, %351 : vector<16x32xf32>
    %c6_134 = arith.constant 6 : index
    %c4_135 = arith.constant 4 : index
    %353 = memref.load %arg2[%c6_134, %c4_135] : memref<8x8xf32, #tpu.memory_space<smem>>
    %354 = vector.extract_strided_slice %4 {offsets = [4, 0, 0], sizes = [1, 16, 32], strides = [1, 1, 1]} : vector<8x16x32xf32> to vector<1x16x32xf32>
    %355 = vector.shape_cast %354 : vector<1x16x32xf32> to vector<16x32xf32>
    %356 = vector.broadcast %353 : f32 to vector<16x32xf32>
    %357 = arith.mulf %356, %355 : vector<16x32xf32>
    %358 = arith.addf %352, %357 : vector<16x32xf32>
    %c6_136 = arith.constant 6 : index
    %c5_137 = arith.constant 5 : index
    %359 = memref.load %arg2[%c6_136, %c5_137] : memref<8x8xf32, #tpu.memory_space<smem>>
    %360 = vector.extract_strided_slice %4 {offsets = [5, 0, 0], sizes = [1, 16, 32], strides = [1, 1, 1]} : vector<8x16x32xf32> to vector<1x16x32xf32>
    %361 = vector.shape_cast %360 : vector<1x16x32xf32> to vector<16x32xf32>
    %362 = vector.broadcast %359 : f32 to vector<16x32xf32>
    %363 = arith.mulf %362, %361 : vector<16x32xf32>
    %364 = arith.addf %358, %363 : vector<16x32xf32>
    %c6_138 = arith.constant 6 : index
    %c6_139 = arith.constant 6 : index
    %365 = memref.load %arg2[%c6_138, %c6_139] : memref<8x8xf32, #tpu.memory_space<smem>>
    %366 = vector.extract_strided_slice %4 {offsets = [6, 0, 0], sizes = [1, 16, 32], strides = [1, 1, 1]} : vector<8x16x32xf32> to vector<1x16x32xf32>
    %367 = vector.shape_cast %366 : vector<1x16x32xf32> to vector<16x32xf32>
    %368 = vector.broadcast %365 : f32 to vector<16x32xf32>
    %369 = arith.mulf %368, %367 : vector<16x32xf32>
    %370 = arith.addf %364, %369 : vector<16x32xf32>
    %c6_140 = arith.constant 6 : index
    %c7_141 = arith.constant 7 : index
    %371 = memref.load %arg2[%c6_140, %c7_141] : memref<8x8xf32, #tpu.memory_space<smem>>
    %372 = vector.extract_strided_slice %4 {offsets = [7, 0, 0], sizes = [1, 16, 32], strides = [1, 1, 1]} : vector<8x16x32xf32> to vector<1x16x32xf32>
    %373 = vector.shape_cast %372 : vector<1x16x32xf32> to vector<16x32xf32>
    %374 = vector.broadcast %371 : f32 to vector<16x32xf32>
    %375 = arith.mulf %374, %373 : vector<16x32xf32>
    %376 = arith.addf %370, %375 : vector<16x32xf32>
    %377 = vector.broadcast %5 : vector<1x32xf32> to vector<16x32xf32>
    %378 = arith.addf %376, %377 : vector<16x32xf32>
    %cst_142 = arith.constant 0.000000e+00 : f32
    %379 = vector.broadcast %cst_142 : f32 to vector<16x32xf32>
    %380 = arith.maximumf %378, %379 : vector<16x32xf32>
    %c0_143 = arith.constant 0 : index
    %c6_144 = arith.constant 6 : index
    %c0_145 = arith.constant 0 : index
    %c0_146 = arith.constant 0 : index
    %381 = vector.load %arg6[%c0_143, %c6_144, %c0_145, %c0_146] : memref<1x8x16x32xf32, #tpu.memory_space<vmem>>, vector<1x1x16x32xf32>
    %382 = vector.shape_cast %381 : vector<1x1x16x32xf32> to vector<16x32xf32>
    %383 = vector.shape_cast %380 : vector<16x32xf32> to vector<1x1x16x32xf32>
    tpu.vector_store %arg6[%c0_143, %c6_144, %c0_145, %c0_146], %383 {strides = array<i32>} : memref<1x8x16x32xf32, #tpu.memory_space<vmem>>, vector<1x1x16x32xf32>,
    %c7_147 = arith.constant 7 : index
    %c0_148 = arith.constant 0 : index
    %384 = memref.load %arg2[%c7_147, %c0_148] : memref<8x8xf32, #tpu.memory_space<smem>>
    %385 = vector.extract_strided_slice %4 {offsets = [0, 0, 0], sizes = [1, 16, 32], strides = [1, 1, 1]} : vector<8x16x32xf32> to vector<1x16x32xf32>
    %386 = vector.shape_cast %385 : vector<1x16x32xf32> to vector<16x32xf32>
    %387 = vector.broadcast %384 : f32 to vector<16x32xf32>
    %388 = arith.mulf %387, %386 : vector<16x32xf32>
    %c7_149 = arith.constant 7 : index
    %c1_150 = arith.constant 1 : index
    %389 = memref.load %arg2[%c7_149, %c1_150] : memref<8x8xf32, #tpu.memory_space<smem>>
    %390 = vector.extract_strided_slice %4 {offsets = [1, 0, 0], sizes = [1, 16, 32], strides = [1, 1, 1]} : vector<8x16x32xf32> to vector<1x16x32xf32>
    %391 = vector.shape_cast %390 : vector<1x16x32xf32> to vector<16x32xf32>
    %392 = vector.broadcast %389 : f32 to vector<16x32xf32>
    %393 = arith.mulf %392, %391 : vector<16x32xf32>
    %394 = arith.addf %388, %393 : vector<16x32xf32>
    %c7_151 = arith.constant 7 : index
    %c2_152 = arith.constant 2 : index
    %395 = memref.load %arg2[%c7_151, %c2_152] : memref<8x8xf32, #tpu.memory_space<smem>>
    %396 = vector.extract_strided_slice %4 {offsets = [2, 0, 0], sizes = [1, 16, 32], strides = [1, 1, 1]} : vector<8x16x32xf32> to vector<1x16x32xf32>
    %397 = vector.shape_cast %396 : vector<1x16x32xf32> to vector<16x32xf32>
    %398 = vector.broadcast %395 : f32 to vector<16x32xf32>
    %399 = arith.mulf %398, %397 : vector<16x32xf32>
    %400 = arith.addf %394, %399 : vector<16x32xf32>
    %c7_153 = arith.constant 7 : index
    %c3_154 = arith.constant 3 : index
    %401 = memref.load %arg2[%c7_153, %c3_154] : memref<8x8xf32, #tpu.memory_space<smem>>
    %402 = vector.extract_strided_slice %4 {offsets = [3, 0, 0], sizes = [1, 16, 32], strides = [1, 1, 1]} : vector<8x16x32xf32> to vector<1x16x32xf32>
    %403 = vector.shape_cast %402 : vector<1x16x32xf32> to vector<16x32xf32>
    %404 = vector.broadcast %401 : f32 to vector<16x32xf32>
    %405 = arith.mulf %404, %403 : vector<16x32xf32>
    %406 = arith.addf %400, %405 : vector<16x32xf32>
    %c7_155 = arith.constant 7 : index
    %c4_156 = arith.constant 4 : index
    %407 = memref.load %arg2[%c7_155, %c4_156] : memref<8x8xf32, #tpu.memory_space<smem>>
    %408 = vector.extract_strided_slice %4 {offsets = [4, 0, 0], sizes = [1, 16, 32], strides = [1, 1, 1]} : vector<8x16x32xf32> to vector<1x16x32xf32>
    %409 = vector.shape_cast %408 : vector<1x16x32xf32> to vector<16x32xf32>
    %410 = vector.broadcast %407 : f32 to vector<16x32xf32>
    %411 = arith.mulf %410, %409 : vector<16x32xf32>
    %412 = arith.addf %406, %411 : vector<16x32xf32>
    %c7_157 = arith.constant 7 : index
    %c5_158 = arith.constant 5 : index
    %413 = memref.load %arg2[%c7_157, %c5_158] : memref<8x8xf32, #tpu.memory_space<smem>>
    %414 = vector.extract_strided_slice %4 {offsets = [5, 0, 0], sizes = [1, 16, 32], strides = [1, 1, 1]} : vector<8x16x32xf32> to vector<1x16x32xf32>
    %415 = vector.shape_cast %414 : vector<1x16x32xf32> to vector<16x32xf32>
    %416 = vector.broadcast %413 : f32 to vector<16x32xf32>
    %417 = arith.mulf %416, %415 : vector<16x32xf32>
    %418 = arith.addf %412, %417 : vector<16x32xf32>
    %c7_159 = arith.constant 7 : index
    %c6_160 = arith.constant 6 : index
    %419 = memref.load %arg2[%c7_159, %c6_160] : memref<8x8xf32, #tpu.memory_space<smem>>
    %420 = vector.extract_strided_slice %4 {offsets = [6, 0, 0], sizes = [1, 16, 32], strides = [1, 1, 1]} : vector<8x16x32xf32> to vector<1x16x32xf32>
    %421 = vector.shape_cast %420 : vector<1x16x32xf32> to vector<16x32xf32>
    %422 = vector.broadcast %419 : f32 to vector<16x32xf32>
    %423 = arith.mulf %422, %421 : vector<16x32xf32>
    %424 = arith.addf %418, %423 : vector<16x32xf32>
    %c7_161 = arith.constant 7 : index
    %c7_162 = arith.constant 7 : index
    %425 = memref.load %arg2[%c7_161, %c7_162] : memref<8x8xf32, #tpu.memory_space<smem>>
    %426 = vector.extract_strided_slice %4 {offsets = [7, 0, 0], sizes = [1, 16, 32], strides = [1, 1, 1]} : vector<8x16x32xf32> to vector<1x16x32xf32>
    %427 = vector.shape_cast %426 : vector<1x16x32xf32> to vector<16x32xf32>
    %428 = vector.broadcast %425 : f32 to vector<16x32xf32>
    %429 = arith.mulf %428, %427 : vector<16x32xf32>
    %430 = arith.addf %424, %429 : vector<16x32xf32>
    %431 = vector.broadcast %5 : vector<1x32xf32> to vector<16x32xf32>
    %432 = arith.addf %430, %431 : vector<16x32xf32>
    %cst_163 = arith.constant 0.000000e+00 : f32
    %433 = vector.broadcast %cst_163 : f32 to vector<16x32xf32>
    %434 = arith.maximumf %432, %433 : vector<16x32xf32>
    %c0_164 = arith.constant 0 : index
    %c7_165 = arith.constant 7 : index
    %c0_166 = arith.constant 0 : index
    %c0_167 = arith.constant 0 : index
    %435 = vector.load %arg6[%c0_164, %c7_165, %c0_166, %c0_167] : memref<1x8x16x32xf32, #tpu.memory_space<vmem>>, vector<1x1x16x32xf32>
    %436 = vector.shape_cast %435 : vector<1x1x16x32xf32> to vector<16x32xf32>
    %437 = vector.shape_cast %434 : vector<16x32xf32> to vector<1x1x16x32xf32>
    tpu.vector_store %arg6[%c0_164, %c7_165, %c0_166, %c0_167], %437 {strides = array<i32>} : memref<1x8x16x32xf32, #tpu.memory_space<vmem>>, vector<1x1x16x32xf32>,
    return
  }
  func.func @transform_0(%arg0: i32, %arg1: i32) -> (i32, i32) {
    %c0_i32 = arith.constant 0 : i32
    %c0_i32_0 = arith.constant 0 : i32
    %c0_i32_1 = arith.constant 0 : i32
    return %c0_i32, %c0_i32_0 : i32, i32
  }
  func.func @transform_1(%arg0: i32, %arg1: i32) -> (i32, i32) {
    %c0_i32 = arith.constant 0 : i32
    %c0_i32_0 = arith.constant 0 : i32
    %c0_i32_1 = arith.constant 0 : i32
    return %c0_i32, %c0_i32_0 : i32, i32
  }
  func.func @transform_2(%arg0: i32, %arg1: i32) -> (i32, i32) {
    %c0_i32 = arith.constant 0 : i32
    %c0_i32_0 = arith.constant 0 : i32
    %c0_i32_1 = arith.constant 0 : i32
    return %c0_i32, %c0_i32_0 : i32, i32
  }
  func.func @transform_3(%arg0: i32, %arg1: i32) -> (i32, i32, i32, i32) {
    %c0_i32 = arith.constant 0 : i32
    %c0_i32_0 = arith.constant 0 : i32
    %c0_i32_1 = arith.constant 0 : i32
    return %arg0, %c0_i32, %arg1, %c0_i32_0 : i32, i32, i32, i32
  }
  func.func @transform_4(%arg0: i32, %arg1: i32) -> (i32, i32, i32, i32) {
    %c0_i32 = arith.constant 0 : i32
    %c0_i32_0 = arith.constant 0 : i32
    %c0_i32_1 = arith.constant 0 : i32
    return %arg0, %c0_i32, %arg1, %c0_i32_0 : i32, i32, i32, i32
  }
}

</mosaic_0001>

<bundles_post_ra>
// kernel: tpu_custom_call.1
= control target key start
LH: loop header
LB: loop body
LE: loop exit
PB: predicated region body
PF: predicated region fallthrough
CT: control target
= control target key end

     0   :  { %s2616_s0 = inlined_call_operand.hbm [shape: f32[8,8], index: 0, kind: input, shape index: {}]   ;;  %s2617_s1 = inlined_call_operand.hbm [shape: f32[16,32], index: 1, kind: input, shape index: {}]   ;;  %s2618_s2 = inlined_call_operand.vmem [shape: f32[1,32], index: 2, kind: input, shape index: {}]   ;;  %s2619_s3 = inlined_call_operand.hbm [shape: f32[2,8,16,16], index: 3, kind: input, shape index: {}]   ;;  %s2620_s4 = inlined_call_operand.hbm [shape: f32[2,8,16,32], index: 4, kind: output, shape index: {}]  }
   0x1   :  { %2744 = sst [smem:[#allocation104_spill]] %s2616_s0 }
   0x2   :  { %2745 = sst [smem:[#allocation105_spill]] %s2617_s1 }
   0x3   :  { %2746 = sst [smem:[#allocation106_spill]] %s2618_s2 }
   0x4   :  { %2747 = sst [smem:[#allocation107_spill]] %s2619_s3 }
   0x5   :  { %2748 = sst [smem:[#allocation108_spill]] %s2620_s4 }
   0x6   :  { %9 = vsyncpa [#allocation5], 0 }
   0x7   :  { %10 = vsyncpa [#allocation3], 0 }
   0x8   :  { %11 = vsyncpa [#allocation8], 0 }
   0x9   :  { %13 = vsyncpa [#allocation8 + $0x1], 0 }
   0xa   :  { %14 = vsyncpa [#allocation4], 0 }
   0xb   :  { %16 = vsyncpa [#allocation4 + $0x1], 0  ;;  %s1483_s15 = smov 0   ;;  %s1485_s16 = smov 0  }
   0xc   :  { %s1487_s17 = smov 0   ;;  %s1489_s18 = smov 0  }
   0xd   :  { %s1491_s19 = smov 0   ;;  %s1493_s20 = smov 0  }
   0xe LB: > { %2749 = sst [smem:[#allocation14_spill]] %s1428_s15  ;;  %s1033_s21 = sadd.s32 4294967295, %s1448_s20   ;;  %s1448_s20 = sphi %s1493_s20, %s22_s20   ;;  %s1444_s19 = sphi %s1491_s19, %s3054_s19   ;;  %s1440_s18 = sphi %s1489_s18, %s3053_s18   ;;  %s1436_s17 = sphi %s1487_s17, %s3052_s17   ;;  %s1432_s16 = sphi %s1485_s16, %s3051_s16   ;;  %s1428_s15 = sphi %s1483_s15, %s3050_s15  }
   0xf   : > { %2750 = sst [smem:[#allocation15_spill]] %s1432_s16  ;;  %s1034_s22 = sadd.s32 4294967294, %s1448_s20  }
  0x10   : > { %2751 = sst [smem:[#allocation16_spill]] %s1436_s17  ;;  %p113_p0 = scmp.ne.s32.totalorder %s1436_s17, %s1432_s16 }
  0x11   : > { %2752 = sst [smem:[#allocation17_spill]] %s1440_s18  ;;  %p114_p1 = scmp.eq.s32.totalorder %s1448_s20, 0 }
  0x12   : > { %2753 = sst [smem:[#allocation18_spill]] %s1444_s19  ;;  %p119_p2 = scmp.ne.s32.totalorder %s1432_s16, %s1428_s15 }
  0x13   : > { %2754 = sst [smem:[#allocation19_spill]] %s1448_s20  ;;  %p1521_p3 = scmp.eq.s32.totalorder %s1033_s21, 0 }
  0x14   : > { %p145_p4 = scmp.eq.s32.totalorder %s1033_s21, 1  ;;  %p115_p5 = por %p114_p1, %p113_p0 }
  0x15   : > { %s2755_s24 = scalar_select %p1521_p3, 1, 0 }
  0x16   : > { %p151_p6 = scmp.eq.s32.totalorder %s1034_s22, 1  ;;  %p1527_p7 = por %p1521_p3, %p119_p2 }
  0x17   : > { %p1531_p8 = por %p145_p4, %p113_p0  ;;  %p1035_p10 = scmp.ge.s32.totalorder %s1448_s20, 1 }
  0x18   : > { %s2756_s25 = scalar_select %p1527_p7, 1, 0 }
  0x19   : > { %s2757_s26 = scalar_select %p1531_p8, 1, 0 }
  0x1a   : > { %p1535_p9 = por %p151_p6, %p119_p2  ;;  %p158_p11 = scmp.lt.s32.totalorder %s1448_s20, 3 }
  0x1b   : > { %2758 = sst [smem:[#allocation20_spill]] %s2757_s26  ;;  %p1229_p1 = scmp.lt.s32.totalorder %s1448_s20, 2 }
  0x1c   : > { %s2759_s27 = scalar_select %p1535_p9, 1, 0 }
  0x1d   : > { %p1542_p13 = pnand %p1035_p10, %p158_p11  ;;  %p1549_p7 = pnand %p1229_p1, %p115_p5 }
  0x1e   : > { %2760 = sst [smem:[#allocation21_spill]] %s2759_s27  ;;  %s1450_s30 = smov [#allocation6]  }
  0x1f   : > { %s2761_s28 = scalar_select %p1542_p13, 1, 0 }
  0x20   : > { %p1212_p3 = pneg %p1542_p13  ;;  %s179_s5 = sshll.u32 %s1450_s30, 4  ;;  %s1559_s5 = int_to_ptr.vmem [resolvable:$true] %s179_s5 }
  0x21   : > { %p2763_p0 = scmp.ne.s32.totalorder %s2755_s24, 0  ;;  %s2765_s0 = sld [smem:[#allocation104_spill]] }
  0x23   : > { %p1555_p2 = pnand %p1212_p3, %p2763_p0 }
  0x25   : > { %p1289_p5 = pneg %p1555_p2 }
  0x27   : > { %s1287_s9 = scalar_lea.hbm %s2765_s0, 128 }
  0x28   : > { %p1288_p4 = scmp.ne.s32.totalorder %s2765_s0, %s1287_s9  ;;  %p1294_p10 = scmp.lt.u32.totalorder %s1287_s9, %s2765_s0 }
  0x2a   : > { %p1290_p3 = pnand %p1289_p5, %p1288_p4 }
  0x2c   : > { %p1291_p6 = pneg %p1290_p3 }
  0x2e   : > { %p1296_p11 = pnand %p1294_p10, %p1291_p6 }
  0x30   : > { %1299 = shalt.err (!%p1296_p11)
}
  0x31   : > { %s1451_s14 = smov [#allocation2]   ;;  %s2766_s1 = sld [smem:[#allocation105_spill]] }
  0x32   : > { %1215 = dma.hbm_to_smem (!%p1555_p2), %s2765_s0, 128, %s1451_s14, [#allocation5]  }
  0x37   : > { %s1300_s8 = scalar_lea.hbm %s2766_s1, 256 }
  0x38   : > { %p1301_p1 = scmp.ne.s32.totalorder %s2766_s1, %s1300_s8  ;;  %p1307_p3 = scmp.lt.u32.totalorder %s1300_s8, %s2766_s1 }
  0x3a   : > { %p1303_p0 = pnand %p1301_p1, %p1289_p5 }
  0x3c   : > { %p1304_p4 = pneg %p1303_p0 }
  0x3e   : > { %p1309_p6 = pnand %p1307_p3, %p1304_p4 }
  0x40   : > { %1312 = shalt.err (!%p1309_p6)
}
  0x41   : > { %s1313_s13 = scalar_lea.vmem %s1559_s5, 256  ;;  %p1321_p9 = scmp.lt.s32.totalorder %s1559_s5, %s1559_s5 }
  0x42   : > { %p1314_p10 = scmp.ne.s32.totalorder %s1559_s5, %s1313_s13  ;;  %p1322_p1 = scmp.lt.s32.totalorder %s1313_s13, %s1313_s13 }
  0x44   : > { %p1316_p11 = pnand %p1314_p10, %p1289_p5  ;;  %p1323_p0 = por %p1322_p1, %p1321_p9 }
  0x46   : > { %p1317_p12 = pneg %p1316_p11 }
  0x48   : > { %p1324_p8 = pnand %p1323_p0, %p1317_p12 }
  0x4a   : > { %1327 = shalt.err (!%p1324_p8)
}
  0x4b   : > { %s2625_s14 = smov 128   ;;  %s1453_s21 = smov 8  }
  0x4c   : > { %1218 = dma.hbm_to_vmem [thread:$0]  (!%p1555_p2), %s2766_s1, 256, %s1559_s5, [#allocation3], %s2625_s14, %s2625_s14, %s1453_s21  }
  0x4d   : > { %s34_s7 = sadd.s32 1, %s1444_s19  ;;  %s196_s8 = sand.u32 1, %s1436_s17  }
  0x4e   : > { %p36_p8 = scmp.ge.s32.totalorder %s34_s7, 2  ;;  %s1039_s10 = sshll.u32 %s196_s8, 7 }
  0x4f   : > { %s1146_s11 = sshll.u32 %s1444_s19, 11  ;;  %s2768_s3 = sld [smem:[#allocation107_spill]] }
  0x50   : > { %s3056_s7 = smov (%p36_p8, %s34_s7), 0  ;;  %s200_s13 = scalar_lea.vmem [#allocation7], %s1039_s10 }
  0x51   : > { %2767 = sst [smem:[#allocation22_spill]] %s3056_s7  ;;  %s101_s5 = ssub.s32 %s1444_s19, %s3056_s7 }
  0x52   : > { %s209_s22 = sshll.u32 %s200_s13, 4  ;;  %p1620_p9 = scmp.eq.s32.totalorder %s101_s5, 0  ;;  %s1624_s22 = int_to_ptr.vmem [resolvable:$true] %s209_s22 }
  0x53   : > { %s1626_s23 = scalar_lea.sflag [#allocation8], %s196_s8  ;;  %p1330_p2 = pneg %p1549_p7 }
  0x55   : > { %s1616_s6 = scalar_lea.hbm %s2768_s3, %s1146_s11  ;;  %s1333_s10 = scalar_lea.hbm %s2768_s3, 4096 }
  0x56   : > { %s1328_s14 = scalar_lea.hbm %s1616_s6, 2048  ;;  %p1334_p3 = scmp.lt.u32.totalorder %s1616_s6, %s2768_s3 }
  0x57   : > { %p1329_p12 = scmp.ne.s32.totalorder %s1616_s6, %s1328_s14  ;;  %p1335_p6 = scmp.lt.u32.totalorder %s1333_s10, %s1328_s14 }
  0x58   : > { %p1337_p11 = scmp.lt.u32.totalorder %s1328_s14, %s1616_s6 }
  0x59   : > { %p1331_p5 = pnand %p1330_p2, %p1329_p12  ;;  %p1336_p10 = por %p1335_p6, %p1334_p3 }
  0x5b   : > { %p1332_p4 = pneg %p1331_p5  ;;  %p1338_p1 = por %p1337_p11, %p1336_p10 }
  0x5d   : > { %p1339_p0 = pnand %p1338_p1, %p1332_p4 }
  0x5f   : > { %1342 = shalt.err (!%p1339_p0)
}
  0x60   : > { %s1343_s8 = scalar_lea.vmem %s1624_s22, 2048  ;;  %s1454_s13 = smov [#allocation7]  }
  0x61   : > { %p1344_p8 = scmp.ne.s32.totalorder %s1624_s22, %s1343_s8  ;;  %s1348_s11 = sshll.u32 %s1454_s13, 4  ;;  %s1349_s11 = int_to_ptr.vmem [resolvable:$false] %s1348_s11 }
  0x62   : > { %s1350_s9 = scalar_lea.vmem %s1349_s11, 4096  ;;  %p1351_p13 = scmp.lt.s32.totalorder %s1624_s22, %s1349_s11 }
  0x63   : > { %p1346_p12 = pnand %p1344_p8, %p1330_p2  ;;  %p1352_p3 = scmp.lt.s32.totalorder %s1350_s9, %s1343_s8 }
  0x65   : > { %p1347_p5 = pneg %p1346_p12  ;;  %p1353_p6 = por %p1352_p3, %p1351_p13 }
  0x67   : > { %p1354_p10 = pnand %p1353_p6, %p1347_p5 }
  0x69   : > { %1357 = shalt.err (!%p1354_p10)
}
  0x6a   : > { %s2770_s14 = smov 128   ;;  %s2771_s10 = sadd.s32 1, %s1436_s17 }
  0x6b   : > { %1222 = dma.hbm_to_vmem [thread:$0]  (!%p1549_p7), %s1616_s6, 2048, %s1624_s22, %s1626_s23, %s2770_s14, %s2770_s14, %s1453_s21  }
  0x6c   : > { %s1662_s12 = scalar_select %p1620_p9, %s1436_s17, %s2771_s10  }
  0x6d   : > { %p2773_p13 = scmp.ne.s32.totalorder %s2761_s28, 0 }
  0x6e   : > { %2772 = sst [smem:[#allocation23_spill]] %s1662_s12 }
  0x6f   : > { %221 = sbr.rel (%p2773_p13) target bundleno = 454 (0x1c6), region = 36 }
  0x76   : > { %p2774_p2 = scmp.ne.s32.totalorder %s2755_s24, 0 }
  0x78   : > { %1411 = dma.done.wait (%p2774_p2), [#allocation5], 128  }
  0x79   : > { %1413 = vsyncadd (%p2774_p2), [#allocation5], 4294967168 }
  0x7a   : > { %1415 = dma.done.wait (%p2774_p2), [#allocation3], 256  }
  0x7b   : > { %1417 = vsyncadd (%p2774_p2), [#allocation3], 4294967040  ;;  %s1675_s23 = sand.u32 1, %s1432_s16   ;;  %p2776_p7 = scmp.ne.s32.totalorder %s2756_s25, 0 }
  0x7c   : > { %2775 = sst [smem:[#allocation24_spill]] %s1675_s23  ;;  %s2627_s28 = sshll.u32 %s1675_s23, 7 }
  0x7d   : > { %s232_s29 = scalar_lea.sflag [#allocation8], %s1675_s23  ;;  %s1681_s21 = scalar_lea.vmem [#allocation7], %s2627_s28 }
  0x7e   : > { %1419 = dma.done.wait (%p2776_p7), %s232_s29, 2048  }
  0x7f   : > { %1421 = vsyncadd (%p2776_p7), %s232_s29, 4294965248 }
  0x80   : > { %240 = sfence }
  0x81   : > { %v279_v0 = vld [vmem:[#allocation6] sm:$0xff]  ;;  %v280_v1 = vld [vmem:[#allocation6 + $0x8] sm:$0xff]  ;;  %v263_v2 = vld [vmem:[%s1681_s21] sm:$0xff]  ;;  %vm281_vm0 = vcmask 130048   ;;  %s1719_s24 = sld [smem:[#allocation2]]  ;;  %s1735_s11 = sld [smem:[#allocation2 + $0x1]] }
  0x82   : > { %v1194_v3 = vpack.c.bf16 %v280_v1, %v279_v0  ;;  %1170 = vmatprep.mubr.msk.f32.mxu0 %vm281_vm0, %v263_v2  ;;  %v271_v4 = vld [vmem:[%s1681_s21 + $0x40] sm:$0xff]  ;;  %v264_v5 = vld [vmem:[%s1681_s21 + $0x8] sm:$0xff]  ;;  %v265_v7 = vld [vmem:[%s1681_s21 + $0x10] sm:$0xff]  ;;  %s1721_s25 = sld [smem:[#allocation2 + $0x80]]  ;;  %s1737_s9 = sld [smem:[#allocation2 + $0x81]]  ;;  %vm532_vm1 = vcmask 261120  }
  0x83   : > { %v272_v6 = vld [vmem:[%s1681_s21 + $0x48] sm:$0xff]  ;;  %1182 = vmatprep.mubr.msk.f32.mxu1 %vm281_vm0, %v271_v4  ;;  %v273_v8 = vld [vmem:[%s1681_s21 + $0x50] sm:$0xff]  ;;  %v266_v9 = vld [vmem:[%s1681_s21 + $0x18] sm:$0xff]  ;;  %s1723_s6 = sld [smem:[#allocation2 + $0x100]]  ;;  %s1739_s14 = sld [smem:[#allocation2 + $0x101]] }
  0x84   : > { %1195 = vmatprep.subr.bf16.mxu0 %v1194_v3  ;;  %1198 = vmatprep.subr.bf16.mxu1 %v1194_v3  ;;  %v274_v10 = vld [vmem:[%s1681_s21 + $0x58] sm:$0xff]  ;;  %v267_v11 = vld [vmem:[%s1681_s21 + $0x20] sm:$0xff]  ;;  %v268_v13 = vld [vmem:[%s1681_s21 + $0x28] sm:$0xff]  ;;  %s1725_s22 = sld [smem:[#allocation2 + $0x180]]  ;;  %s1741_s10 = sld [smem:[#allocation2 + $0x181]] }
  0x85   : > { %1197 = vmatpush3.bf16.msra.mxu0 %v1194_v3  ;;  %1199 = vmatpush3.bf16.msra.mxu1 %v1194_v3  ;;  %v275_v12 = vld [vmem:[%s1681_s21 + $0x60] sm:$0xff]  ;;  %v276_v14 = vld [vmem:[%s1681_s21 + $0x68] sm:$0xff]  ;;  %v269_v15 = vld [vmem:[%s1681_s21 + $0x30] sm:$0xff]  ;;  %s1727_s30 = sld [smem:[#allocation2 + $0x200]]  ;;  %s1743_s29 = sld [smem:[#allocation2 + $0x201]] }
  0x86   : > { %v277_v16 = vld [vmem:[%s1681_s21 + $0x70] sm:$0xff]  ;;  %v270_v17 = vld [vmem:[%s1681_s21 + $0x38] sm:$0xff]  ;;  %s1729_s5 = sld [smem:[#allocation2 + $0x280]]  ;;  %s1747_s28 = sld [smem:[#allocation2 + $0x301]] }
  0x87   : > { %v278_v18 = vld [vmem:[%s1681_s21 + $0x78] sm:$0xff]  ;;  %2777 = sst [smem:[#allocation25_spill]] %s1719_s24  ;;  %s1731_s8 = sld [smem:[#allocation2 + $0x300]]  ;;  %v477_v19 = vstv %s1719_s24  ;;  %v481_v27 = vstv %s1735_s11 }
  0x88   : > { %1171 = vmatmul.mubr.msk.f32.vlgmr.msra.gmra.mrb[0].mxu0 %vm281_vm0, %v264_v5  ;;  %1183 = vmatmul.mubr.msk.f32.vlgmr.msra.gmra.mrb[0].mxu1 %vm281_vm0, %v272_v6  ;;  %2778 = sst [smem:[#allocation26_spill]] %s1721_s25  ;;  %s1733_s13 = sld [smem:[#allocation2 + $0x380]]  ;;  %v536_v20 = vstv %s1721_s25  ;;  %v540_v28 = vstv %s1737_s9 }
  0x89   : > { %1173 = vmatprep.mubr.msk.f32.mxu0 %vm281_vm0, %v265_v7  ;;  %1185 = vmatprep.mubr.msk.f32.mxu1 %vm281_vm0, %v273_v8  ;;  %2779 = sst [smem:[#allocation27_spill]] %s1723_s6  ;;  %s1745_s21 = sld [smem:[#allocation2 + $0x281]]  ;;  %v589_v21 = vstv %s1723_s6  ;;  %v593_v29 = vstv %s1739_s14 }
  0x8a   : > { %2780 = sst [smem:[#allocation28_spill]] %s1725_s22  ;;  %s1749_s0 = sld [smem:[#allocation2 + $0x381]]  ;;  %v642_v22 = vstv %s1725_s22  ;;  %v646_v30 = vstv %s1741_s10 }
  0x8b   : > { %2781 = sst [smem:[#allocation29_spill]] %s1727_s30  ;;  %s1751_s1 = sld [smem:[#allocation2 + $0x4]]  ;;  %v695_v23 = vstv %s1727_s30  ;;  %v699_v31 = vstv %s1743_s29 }
  0x8c   : > { %1174 = vmatmul.mubr.msk.f32.gmra.mrb[2].mxu0 %vm281_vm0, %v266_v9  ;;  %1186 = vmatmul.mubr.msk.f32.gmra.mrb[2].mxu1 %vm281_vm0, %v274_v10  ;;  %2782 = sst [smem:[#allocation30_spill]] %s1729_s5  ;;  %s1753_s3 = sld [smem:[#allocation2 + $0x84]]  ;;  %v748_v24 = vstv %s1729_s5  ;;  %v805_v33 = vstv %s1747_s28 }
  0x8d   : > { %1176 = vmatprep.mubr.msk.f32.mxu0 %vm281_vm0, %v267_v11  ;;  %1188 = vmatprep.mubr.msk.f32.mxu1 %vm281_vm0, %v275_v12  ;;  %2783 = sst [smem:[#allocation31_spill]] %s1731_s8  ;;  %s1755_s7 = sld [smem:[#allocation2 + $0x104]]  ;;  %v801_v25 = vstv %s1731_s8 }
  0x8e   : > { %2784 = sst [smem:[#allocation32_spill]] %s1733_s13  ;;  %s1757_s19 = sld [smem:[#allocation2 + $0x184]]  ;;  %v854_v26 = vstv %s1733_s13 }
  0x8f   : > { %2785 = sst [smem:[#allocation33_spill]] %s1735_s11  ;;  %s1759_s12 = sld [smem:[#allocation2 + $0x204]]  ;;  %v752_v32 = vstv %s1745_s21 }
  0x90   : > { %1177 = vmatmul.mubr.msk.f32.gmra.mrb[4].mxu0 %vm281_vm0, %v268_v13  ;;  %1189 = vmatmul.mubr.msk.f32.gmra.mrb[4].mxu1 %vm281_vm0, %v276_v14  ;;  %2786 = sst [smem:[#allocation34_spill]] %s1737_s9  ;;  %s1767_s27 = sld [smem:[#allocation2 + $0x2]]  ;;  %v858_v34 = vstv %s1749_s0 }
  0x91   : > { %1179 = vmatprep.mubr.msk.f32.mxu0 %vm281_vm0, %v269_v15  ;;  %1191 = vmatprep.mubr.msk.f32.mxu1 %vm281_vm0, %v277_v16  ;;  %2787 = sst [smem:[#allocation35_spill]] %s1739_s14  ;;  %s1761_s17 = sld [smem:[#allocation2 + $0x284]]  ;;  %v499_v35 = vstv %s1751_s1 }
  0x92   : > { %2788 = sst [smem:[#allocation36_spill]] %s1741_s10  ;;  %s1763_s16 = sld [smem:[#allocation2 + $0x304]]  ;;  %v558_v36 = vstv %s1753_s3 }
  0x93   : > { %2789 = sst [smem:[#allocation37_spill]] %s1743_s29  ;;  %s1765_s20 = sld [smem:[#allocation2 + $0x384]]  ;;  %v611_v37 = vstv %s1755_s7 }
  0x94   : > { %1180 = vmatmul.mubr.msk.f32.gmra.mrb[6].mxu0 %vm281_vm0, %v270_v17  ;;  %1192 = vmatmul.mubr.msk.f32.gmra.mrb[6].mxu1 %vm281_vm0, %v278_v18  ;;  %2790 = sst [smem:[#allocation38_spill]] %s1745_s21  ;;  %s1769_s15 = sld [smem:[#allocation2 + $0x82]]  ;;  %v664_v38 = vstv %s1757_s19 }
  0x95   : > { %2791 = sst [smem:[#allocation39_spill]] %s1747_s28  ;;  %s1771_s4 = sld [smem:[#allocation2 + $0x102]] }
  0x96   : > { %2792 = sst [smem:[#allocation40_spill]] %s1749_s0  ;;  %s1829_s25 = sld [smem:[#allocation2 + $0x186]] }
  0x97   : > { %2793 = sst [smem:[#allocation41_spill]] %s1751_s1  ;;  %s1773_s26 = sld [smem:[#allocation2 + $0x182]] }
  0x98   : > { %2794 = sst [smem:[#allocation42_spill]] %s1753_s3  ;;  %s1775_s18 = sld [smem:[#allocation2 + $0x202]]  ;;  %v823_v41 = vstv %s1763_s16 }
  0x99   : > { %2795 = sst [smem:[#allocation43_spill]] %s1755_s7  ;;  %s1777_s23 = sld [smem:[#allocation2 + $0x282]] }
  0x9a   : > { %2796 = sst [smem:[#allocation44_spill]] %s1757_s19  ;;  %s1779_s2 = sld [smem:[#allocation2 + $0x302]]  ;;  %v2735_v44 = vstv %s1769_s15 }
  0x9b   : > { %2797 = sst [smem:[#allocation45_spill]] %s1759_s12  ;;  %s1781_s12 = sld [smem:[#allocation2 + $0x382]] }
  0x9c   : > { %2798 = sst [smem:[#allocation46_spill]] %s1761_s17  ;;  %s1783_s17 = sld [smem:[#allocation2 + $0x5]] }
  0x9d   : > { %2799 = sst [smem:[#allocation47_spill]] %s1763_s16  ;;  %s2824_s22 = sld [smem:[#allocation45_spill]] }
  0x9e   : > { %2800 = sst [smem:[#allocation48_spill]] %s1765_s20  ;;  %s1785_s20 = sld [smem:[#allocation2 + $0x85]] }
  0x9f   : > { %2801 = sst [smem:[#allocation49_spill]] %s1767_s27  ;;  %s1787_s27 = sld [smem:[#allocation2 + $0x105]] }
  0xa0   : > { %2802 = sst [smem:[#allocation50_spill]] %s1769_s15  ;;  %s2825_s6 = sld [smem:[#allocation46_spill]] }
  0xa1   : > { %2803 = sst [smem:[#allocation51_spill]] %s1771_s4  ;;  %s1835_s24 = sld [smem:[#allocation2 + $0x206]] }
  0xa2   : > { %2804 = sst [smem:[#allocation52_spill]] %s1773_s26  ;;  %s1789_s4 = sld [smem:[#allocation2 + $0x185]] }
  0xa3   : > { %2805 = sst [smem:[#allocation53_spill]] %s1775_s18  ;;  %s1791_s26 = sld [smem:[#allocation2 + $0x205]]  ;;  %v717_v39 = vstv %s2824_s22 }
  0xa4   : > { %2806 = sst [smem:[#allocation54_spill]] %s1777_s23  ;;  %s1793_s18 = sld [smem:[#allocation2 + $0x285]] }
  0xa5   : > { %2807 = sst [smem:[#allocation55_spill]] %s1779_s2  ;;  %s1795_s23 = sld [smem:[#allocation2 + $0x305]] }
  0xa6   : > { %2808 = sst [smem:[#allocation56_spill]] %s1781_s12  ;;  %s1797_s12 = sld [smem:[#allocation2 + $0x385]]  ;;  %v770_v40 = vstv %s2825_s6 }
  0xa7   : > { %2809 = sst [smem:[#allocation57_spill]] %s1783_s17  ;;  %s1837_s5 = sld [smem:[#allocation2 + $0x286]] }
  0xa8   : > { %2810 = sst [smem:[#allocation58_spill]] %s1785_s20  ;;  %s1799_s17 = sld [smem:[#allocation2 + $0x3]] }
  0xa9   : > { %2811 = sst [smem:[#allocation59_spill]] %s1787_s27  ;;  %s1801_s20 = sld [smem:[#allocation2 + $0x83]] }
  0xaa   : > { %2812 = sst [smem:[#allocation60_spill]] %s1789_s4  ;;  %s1803_s27 = sld [smem:[#allocation2 + $0x103]] }
  0xab   : > { %2813 = sst [smem:[#allocation61_spill]] %s1793_s18  ;;  %s1805_s4 = sld [smem:[#allocation2 + $0x183]] }
  0xac   : > { %2814 = sst [smem:[#allocation62_spill]] %s1795_s23  ;;  %s1807_s2 = sld [smem:[#allocation2 + $0x203]] }
  0xad   : > { %2815 = sst [smem:[#allocation63_spill]] %s1797_s12  ;;  %s1809_s18 = sld [smem:[#allocation2 + $0x283]] }
  0xae   : > { %2816 = sst [smem:[#allocation64_spill]] %s1799_s17  ;;  %s1811_s23 = sld [smem:[#allocation2 + $0x303]] }
  0xaf   : > { %2817 = sst [smem:[#allocation65_spill]] %s1801_s20  ;;  %s2828_s8 = sld [smem:[#allocation48_spill]] }
  0xb0   : > { %2818 = sst [smem:[#allocation66_spill]] %s1803_s27  ;;  %s1813_s12 = sld [smem:[#allocation2 + $0x383]] }
  0xb1   : > { %s1819_s27 = sld [smem:[#allocation2 + $0x6]]  ;;  %2826 = sst [smem:[#allocation72_spill]] %s1835_s24 }
  0xb2   : > { %2819 = sst [smem:[#allocation67_spill]] %s1807_s2  ;;  %s1821_s2 = sld [smem:[#allocation2 + $0x86]] }
  0xb3   : > { %2820 = sst [smem:[#allocation68_spill]] %s1809_s18  ;;  %s2829_s13 = sld [smem:[#allocation49_spill]] }
  0xb4   : > { %2821 = sst [smem:[#allocation69_spill]] %s1811_s23  ;;  %s1843_s30 = sld [smem:[#allocation2 + $0x306]] }
  0xb5   : > { %2827 = sst [smem:[#allocation73_spill]] %s1837_s5  ;;  %s2831_s11 = sld [smem:[#allocation51_spill]]  ;;  %v876_v42 = vstv %s2828_s8 }
  0xb6   : > { %2822 = sst [smem:[#allocation70_spill]] %s1813_s12  ;;  %s1827_s12 = sld [smem:[#allocation2 + $0x106]] }
  0xb7   : > { %2823 = sst [smem:[#allocation71_spill]] %s1819_s27  ;;  %s1845_s9 = sld [smem:[#allocation2 + $0x386]] }
  0xb8   : > { %s2833_s14 = sld [smem:[#allocation52_spill]]  ;;  %s2834_s10 = sld [smem:[#allocation53_spill]] }
  0xb9   : > { %s2835_s24 = sld [smem:[#allocation54_spill]]  ;;  %s1851_s5 = sld [smem:[#allocation2 + $0x7]]  ;;  %v2732_v43 = vstv %s2829_s13 }
  0xba   : > { %2830 = sst [smem:[#allocation74_spill]] %s1843_s30  ;;  %s2837_s29 = sld [smem:[#allocation55_spill]] }
  0xbb   : > { %s1853_s21 = sld [smem:[#allocation2 + $0x87]]  ;;  %s2839_s28 = sld [smem:[#allocation56_spill]]  ;;  %v2733_v45 = vstv %s2831_s11 }
  0xbc   : > { %s2840_s0 = sld [smem:[#allocation57_spill]]  ;;  %s2841_s30 = sld [smem:[#allocation58_spill]] }
  0xbd   : > { %2832 = sst [smem:[#allocation75_spill]] %s1845_s9  ;;  %s1859_s9 = sld [smem:[#allocation2 + $0x107]] }
  0xbe   : > { %s2843_s1 = sld [smem:[#allocation59_spill]]  ;;  %s1861_s3 = sld [smem:[#allocation2 + $0x187]]  ;;  %v2734_v46 = vstv %s2833_s14  ;;  %v2736_v47 = vstv %s2834_s10 }
  0xbf   : > { %2836 = sst [smem:[#allocation76_spill]] %s1851_s5  ;;  %s2846_s19 = sld [smem:[#allocation61_spill]]  ;;  %v2737_v48 = vstv %s2835_s24 }
  0xc0   : > { %s2845_s7 = sld [smem:[#allocation60_spill]]  ;;  %s1867_s22 = sld [smem:[#allocation2 + $0x207]]  ;;  %v2738_v49 = vstv %s2837_s29 }
  0xc1   : > { %2838 = sst [smem:[#allocation77_spill]] %s1853_s21  ;;  %s2852_s6 = sld [smem:[#allocation67_spill]]  ;;  %v2739_v50 = vstv %s2839_s28 }
  0xc2   : > { %s1869_s16 = sld [smem:[#allocation2 + $0x287]]  ;;  %s2856_s24 = sld [smem:[#allocation72_spill]] }
  0xc3   : > { %2842 = sst [smem:[#allocation57_spill]] %s1859_s9  ;;  %s1875_s15 = sld [smem:[#allocation2 + $0x307]] }
  0xc4   : > { %2844 = sst [smem:[#allocation58_spill]] %s1861_s3  ;;  %s1877_s11 = sld [smem:[#allocation2 + $0x387]] }
  0xc5   : > { %s2857_s29 = sld [smem:[#allocation73_spill]]  ;;  %s2890_s28 = sld [smem:[#allocation50_spill]] }
  0xc6   : > { %2849 = sst [smem:[#allocation59_spill]] %s1867_s22  ;;  %s2888_s10 = sld [smem:[#allocation49_spill]] }
  0xc7   : > { %s2891_s3 = sld [smem:[#allocation51_spill]]  ;;  %s2894_s22 = sld [smem:[#allocation54_spill]] }
  0xc8   : > { %2850 = sst [smem:[#allocation60_spill]] %s1869_s16  ;;  %s2895_s5 = sld [smem:[#allocation55_spill]] }
  0xc9   : > { %2853 = sst [smem:[#allocation61_spill]] %s1875_s15  ;;  %s2892_s16 = sld [smem:[#allocation52_spill]] }
  0xca   : > { %2854 = sst [smem:[#allocation67_spill]] %s1877_s11  ;;  %s2893_s15 = sld [smem:[#allocation53_spill]] }
  0xcb   : > { %s2896_s11 = sld [smem:[#allocation56_spill]]  ;;  %s2904_s13 = sld [smem:[#allocation62_spill]] }
  0xcc   : > { %s2907_s9 = sld [smem:[#allocation63_spill]]  ;;  %s2990_s17 = sld [smem:[#allocation77_spill]] }
  0xcd   : > { %s3017_s18 = sld [smem:[#allocation24_spill]]  ;;  %s3018_s20 = sld [smem:[#allocation59_spill]] }
  0xce   : > { %s3024_s8 = sld [smem:[#allocation60_spill]]  ;;  %s3031_s14 = sld [smem:[#allocation61_spill]] }
  0xcf   : > { %s3034_s21 = sld [smem:[#allocation67_spill]] }
  0xd3   : > { %s3021_s27 = sshll.u32 %s3017_s18, 7 }
  0xd4   : > { %s2469_s23 = scalar_lea.vmem [#allocation9], %s3021_s27 }
 0x15b   : > { %v1172_v15 = vpop.f32.mrb[0].mxu0  ;;  %v1184_v16 = vpop.f32.mrb[0].mxu1 }
 0x15c   : > { %v479_v11 = vmul.f32 %v1172_v15, %v477_v19  ;;  %v538_v13 = vmul.f32 %v1172_v15, %v536_v20  ;;  %v591_v14 = vmul.f32 %v1172_v15, %v589_v21  ;;  %v644_v12 = vmul.f32 %v1172_v15, %v642_v22  ;;  %v396_v10 = vpop.f32.mrb[1].mxu0  ;;  %v1919_v17 = vpop.f32.mrb[1].mxu1 }
 0x15d   : > { %v697_v8 = vmul.f32 %v1172_v15, %v695_v23  ;;  %v750_v9 = vmul.f32 %v1172_v15, %v748_v24  ;;  %v803_v18 = vmul.f32 %v1172_v15, %v801_v25  ;;  %v856_v7 = vmul.f32 %v1172_v15, %v854_v26 }
 0x15e   : > { %v1931_v6 = vmul.f32 %v477_v19, %v396_v10  ;;  %v1935_v5 = vmul.f32 %v536_v20, %v396_v10  ;;  %v1939_v4 = vmul.f32 %v589_v21, %v396_v10  ;;  %v1943_v3 = vmul.f32 %v642_v22, %v396_v10 }
 0x15f   : > { %v1947_v2 = vmul.f32 %v695_v23, %v396_v10  ;;  %v1951_v15 = vmul.f32 %v748_v24, %v396_v10  ;;  %v1955_v19 = vmul.f32 %v801_v25, %v396_v10  ;;  %v1959_v20 = vmul.f32 %v854_v26, %v396_v10  ;;  %v1175_v1 = vpop.f32.mrb[2].mxu0  ;;  %v1961_v21 = vpop.f32.mrb[2].mxu1 }
 0x160   : > { %v483_v0 = vmul.f32 %v1175_v1, %v481_v27  ;;  %v542_v22 = vmul.f32 %v1175_v1, %v540_v28  ;;  %v595_v63 = vmul.f32 %v1175_v1, %v593_v29  ;;  %v648_v23 = vmul.f32 %v1175_v1, %v646_v30  ;;  %v406_v62 = vpop.f32.mrb[3].mxu0  ;;  %v1971_v24 = vpop.f32.mrb[3].mxu1 }
 0x161   : > { %v701_v25 = vmul.f32 %v1175_v1, %v699_v31  ;;  %v754_v26 = vmul.f32 %v1175_v1, %v752_v32  ;;  %v807_v10 = vmul.f32 %v1175_v1, %v805_v33  ;;  %v860_v61 = vmul.f32 %v1175_v1, %v858_v34 }
 0x162   : > { %v1981_v60 = vadd.f32 %v483_v0, %v479_v11  ;;  %v1983_v59 = vadd.f32 %v542_v22, %v538_v13  ;;  %v1985_v58 = vadd.f32 %v595_v63, %v591_v14  ;;  %v1987_v57 = vadd.f32 %v648_v23, %v644_v12 }
 0x163   : > { %v1989_v56 = vadd.f32 %v701_v25, %v697_v8  ;;  %v1991_v55 = vadd.f32 %v754_v26, %v750_v9  ;;  %v1993_v54 = vadd.f32 %v807_v10, %v803_v18  ;;  %v1995_v0 = vadd.f32 %v860_v61, %v856_v7  ;;  %v1178_v1 = vpop.f32.mrb[4].mxu0  ;;  %v1997_v63 = vpop.f32.mrb[4].mxu1 }
 0x164   : > { %2884 = vst [vmem:[#allocation78_spill] sm:$0xff] %v1997_v63  ;;  %v482_v11 = vmul.f32 %v481_v27, %v406_v62  ;;  %v2003_v8 = vmul.f32 %v540_v28, %v406_v62  ;;  %v2007_v9 = vmul.f32 %v593_v29, %v406_v62  ;;  %v2011_v12 = vmul.f32 %v646_v30, %v406_v62  ;;  %v416_v61 = vpop.f32.mrb[5].mxu0  ;;  %v2013_v7 = vpop.f32.mrb[5].mxu1 }
 0x165   : > { %2889 = vst [vmem:[#allocation79_spill] sm:$0xff] %v2013_v7  ;;  %v2017_v13 = vmul.f32 %v699_v31, %v406_v62  ;;  %v2021_v27 = vmul.f32 %v752_v32, %v406_v62  ;;  %v2025_v28 = vmul.f32 %v805_v33, %v406_v62  ;;  %v2029_v29 = vmul.f32 %v858_v34, %v406_v62 }
 0x166   : > { %v2033_v30 = vmul.f32 %v1184_v16, %v499_v35  ;;  %v2037_v14 = vmul.f32 %v1184_v16, %v558_v36  ;;  %v2041_v31 = vmul.f32 %v1184_v16, %v611_v37  ;;  %v2045_v32 = vmul.f32 %v1184_v16, %v664_v38 }
 0x167   : > { %v2049_v33 = vmul.f32 %v1184_v16, %v717_v39  ;;  %v2053_v34 = vmul.f32 %v1184_v16, %v770_v40  ;;  %v2057_v62 = vmul.f32 %v1184_v16, %v823_v41  ;;  %v2061_v18 = vmul.f32 %v1184_v16, %v876_v42  ;;  %v2063_v22 = vpop.f32.mrb[6].mxu0  ;;  %v2065_v23 = vpop.f32.mrb[6].mxu1 }
 0x168   : > { %2899 = vst [vmem:[#allocation82_spill] sm:$0xff] %v2065_v23  ;;  %v489_v25 = vmul.f32 %v1178_v1, %v2732_v43  ;;  %v548_v26 = vmul.f32 %v1178_v1, %v2735_v44  ;;  %v601_v10 = vmul.f32 %v1178_v1, %v2733_v45  ;;  %v654_v53 = vmul.f32 %v1178_v1, %v2734_v46  ;;  %v2075_v16 = vpop.f32.mrb[7].mxu0  ;;  %v2077_v52 = vpop.f32.mrb[7].mxu1 }
 0x169   : > { %2897 = vst [vmem:[#allocation80_spill] sm:$0xff] %v2057_v62  ;;  %2898 = vst [vmem:[#allocation81_spill] sm:$0xff] %v2061_v18  ;;  %v2081_v51 = vmul.f32 %v1178_v1, %v2736_v47  ;;  %v2085_v43 = vmul.f32 %v1178_v1, %v2737_v48  ;;  %v2089_v45 = vmul.f32 %v1178_v1, %v2738_v49  ;;  %v2910_v7 = vstv %s2892_s16  ;;  %s3042_s16 = sld [smem:[#allocation20_spill]] }
 0x16a   : > { %2900 = vst [vmem:[#allocation83_spill] sm:$0xff] %v2077_v52  ;;  %v2093_v46 = vmul.f32 %v1178_v1, %v2739_v50  ;;  %v500_v44 = vmul.f32 %v499_v35, %v1919_v17  ;;  %v559_v47 = vmul.f32 %v558_v36, %v1919_v17  ;;  %v612_v48 = vmul.f32 %v611_v37, %v1919_v17 }
 0x16b   : > { %v2107_v49 = vmul.f32 %v664_v38, %v1919_v17  ;;  %v2112_v1 = vmul.f32 %v717_v39, %v1919_v17  ;;  %v2117_v35 = vmul.f32 %v770_v40, %v1919_v17  ;;  %v2122_v36 = vmul.f32 %v823_v41, %v1919_v17 }
 0x16c   : > { %2901 = vst [vmem:[#allocation84_spill] sm:$0xff] %v2093_v46  ;;  %v2127_v37 = vmul.f32 %v876_v42, %v1919_v17  ;;  %v2906_v38 = vstv %s2888_s10  ;;  %v2908_v39 = vstv %s2890_s28  ;;  %v2909_v52 = vstv %s2891_s3  ;;  %s2922_s28 = sld [smem:[#allocation64_spill]]  ;;  %s2931_s10 = sld [smem:[#allocation65_spill]] }
 0x16d   : > { %2902 = vst [vmem:[#allocation85_spill] sm:$0xff] %v2117_v35  ;;  %2903 = vst [vmem:[#allocation86_spill] sm:$0xff] %v2122_v36  ;;  %v488_v50 = vmul.f32 %v2906_v38, %v416_v61  ;;  %v547_v23 = vmul.f32 %v2908_v39, %v416_v61  ;;  %v600_v40 = vmul.f32 %v2909_v52, %v416_v61  ;;  %v2911_v62 = vstv %s2893_s15  ;;  %s3039_s3 = sld [smem:[#allocation17_spill]] }
 0x16e   : > { %2905 = vst [vmem:[#allocation87_spill] sm:$0xff] %v2127_v37  ;;  %v653_v18 = vmul.f32 %v2910_v7, %v416_v61  ;;  %v706_v41 = vmul.f32 %v2911_v62, %v416_v61  ;;  %v2912_v36 = vstv %s2894_s22  ;;  %v2913_v42 = vstv %s2895_s5  ;;  %s922_s22 = sshll.u32 %s2469_s23, 4  ;;  %s2563_s22 = int_to_ptr.vmem [resolvable:$true] %s922_s22 }
 0x16f   : > { %v2141_v63 = vmul.f32 %v2912_v36, %v416_v61  ;;  %v2145_v17 = vmul.f32 %v2913_v42, %v416_v61  ;;  %v2914_v38 = vstv %s2896_s11  ;;  %v2915_v37 = vstv %s2840_s0  ;;  %p3044_p4 = scmp.ne.s32.totalorder %s3042_s16, 0 }
 0x170   : > { %v2149_v39 = vmul.f32 %v2914_v38, %v416_v61  ;;  %v2154_v52 = vmul.f32 %v1961_v21, %v2915_v37  ;;  %v2917_v7 = vstv %s2841_s30  ;;  %v2919_v35 = vstv %s2843_s1 }
 0x171   : > { %v2159_v62 = vmul.f32 %v1961_v21, %v2917_v7  ;;  %v2164_v36 = vmul.f32 %v1961_v21, %v2919_v35  ;;  %v2921_v46 = vstv %s2845_s7  ;;  %v2924_v61 = vstv %s1791_s26 }
 0x172   : > { %2916 = vst [vmem:[#allocation88_spill] sm:$0xff] %v2154_v52  ;;  %v2169_v42 = vmul.f32 %v1961_v21, %v2921_v46  ;;  %v2174_v38 = vmul.f32 %v1961_v21, %v2924_v61  ;;  %v2926_v37 = vstv %s2846_s19  ;;  %v2928_v7 = vstv %s2904_s13 }
 0x173   : > { %2918 = vst [vmem:[#allocation89_spill] sm:$0xff] %v2159_v62  ;;  %2920 = vst [vmem:[#allocation90_spill] sm:$0xff] %v2164_v36  ;;  %v2179_v52 = vmul.f32 %v1961_v21, %v2926_v37  ;;  %v2184_v62 = vmul.f32 %v1961_v21, %v2928_v7  ;;  %v2930_v35 = vstv %s2907_s9  ;;  %v2933_v46 = vstv %s2840_s0  ;;  %s2948_s0 = sld [smem:[#allocation66_spill]]  ;;  %s1147_s15 = sshll.u32 %s3039_s3, 11 }
 0x174   : > { %2923 = vst [vmem:[#allocation91_spill] sm:$0xff] %v2169_v42  ;;  %2925 = vst [vmem:[#allocation92_spill] sm:$0xff] %v2174_v38  ;;  %v2189_v36 = vmul.f32 %v1961_v21, %v2930_v35  ;;  %v2194_v42 = vmul.f32 %v2933_v46, %v1971_v24  ;;  %v2935_v61 = vstv %s2841_s30  ;;  %v2937_v37 = vstv %s2843_s1  ;;  %s2957_s1 = sld [smem:[#allocation68_spill]] }
 0x175   : > { %2927 = vst [vmem:[#allocation93_spill] sm:$0xff] %v2179_v52  ;;  %2929 = vst [vmem:[#allocation94_spill] sm:$0xff] %v2184_v62  ;;  %v2199_v38 = vmul.f32 %v2935_v61, %v1971_v24  ;;  %v2204_v52 = vmul.f32 %v2937_v37, %v1971_v24  ;;  %v2939_v7 = vstv %s2845_s7  ;;  %v2941_v21 = vstv %s1791_s26  ;;  %s2966_s26 = sld [smem:[#allocation71_spill]]  ;;  %s2971_s7 = sld [smem:[#allocation74_spill]] }
 0x176   : > { %2932 = vst [vmem:[#allocation95_spill] sm:$0xff] %v2189_v36  ;;  %2934 = vst [vmem:[#allocation96_spill] sm:$0xff] %v2194_v42  ;;  %v2209_v62 = vmul.f32 %v2939_v7, %v1971_v24  ;;  %v2214_v35 = vmul.f32 %v2941_v21, %v1971_v24  ;;  %v2943_v36 = vstv %s2846_s19  ;;  %v2945_v42 = vstv %s2904_s13  ;;  %s2960_s19 = sld [smem:[#allocation69_spill]]  ;;  %s2984_s30 = sld [smem:[#allocation76_spill]] }
 0x177   : > { %2936 = vst [vmem:[#allocation97_spill] sm:$0xff] %v2199_v38  ;;  %2938 = vst [vmem:[#allocation98_spill] sm:$0xff] %v2204_v52  ;;  %v2219_v46 = vmul.f32 %v2943_v36, %v1971_v24  ;;  %v2224_v61 = vmul.f32 %v2945_v42, %v1971_v24  ;;  %v2947_v38 = vstv %s2907_s9  ;;  %v484_v7 = vadd.f32 %v482_v11, %v1931_v6  ;;  %s3043_s13 = sld [smem:[#allocation108_spill]] }
 0x178   : > { %2940 = vst [vmem:[#allocation99_spill] sm:$0xff] %v2209_v62  ;;  %2942 = vst [vmem:[#allocation100_spill] sm:$0xff] %v2214_v35  ;;  %v2229_v37 = vmul.f32 %v2947_v38, %v1971_v24  ;;  %v491_v62 = vadd.f32 %v489_v25, %v1981_v60  ;;  %v2950_v21 = vstv %s2922_s28  ;;  %v543_v42 = vadd.f32 %v2003_v8, %v1935_v5  ;;  %s907_s28 = scalar_lea.sflag [#allocation4], %s3017_s18 }
 0x179   : > { %2944 = vst [vmem:[#allocation101_spill] sm:$0xff] %v2219_v46  ;;  %2946 = vst [vmem:[#allocation102_spill] sm:$0xff] %v2224_v61  ;;  %v494_v35 = vmul.f32 %v2950_v21, %v2075_v16  ;;  %v2951_v52 = vmov %v2950_v21  ;;  %v550_v61 = vadd.f32 %v548_v26, %v1983_v59  ;;  %v2952_v46 = vstv %s2931_s10  ;;  %s1358_s10 = scalar_lea.vmem %s2563_s22, 2048 }
 0x17a   : > { %2949 = vst [vmem:[#allocation103_spill] sm:$0xff] %v2229_v37  ;;  %v495_v36 = vmul.f32 %v2063_v22, %v2951_v52  ;;  %v553_v24 = vmul.f32 %v2952_v46, %v2075_v16  ;;  %v2953_v38 = vmov %v2952_v46  ;;  %v490_v6 = vadd.f32 %v488_v50, %v484_v7  ;;  %p1359_p9 = scmp.ne.s32.totalorder %s2563_s22, %s1358_s10 }
 0x17b   : > { %v554_v37 = vmul.f32 %v2063_v22, %v2953_v38  ;;  %v596_v60 = vadd.f32 %v2007_v9, %v1939_v4  ;;  %v603_v25 = vadd.f32 %v601_v10, %v1985_v58  ;;  %v549_v52 = vadd.f32 %v547_v23, %v543_v42 }
 0x17c   : > { %v497_v11 = vadd.f32 %v495_v36, %v491_v62  ;;  %v2954_v5 = vstv %s2948_s0  ;;  %v496_v46 = vadd.f32 %v494_v35, %v490_v6  ;;  %v649_v4 = vadd.f32 %v2011_v12, %v1943_v3  ;;  %p1360_p11 = pnand %p1359_p9, %p3044_p4  ;;  %s1455_s0 = smov [#allocation9]  }
 0x17d   : > { %v556_v21 = vadd.f32 %v554_v37, %v550_v61  ;;  %v606_v8 = vmul.f32 %v2954_v5, %v2075_v16  ;;  %v2955_v59 = vmov %v2954_v5  ;;  %v602_v50 = vadd.f32 %v600_v40, %v596_v60  ;;  %s2561_s9 = scalar_lea.hbm %s3043_s13, %s1147_s15 }
 0x17e   : > { %v607_v26 = vmul.f32 %v2063_v22, %v2955_v59  ;;  %v2258_v38 = vadd.f32 %v2033_v30, %v497_v11  ;;  %v555_v58 = vadd.f32 %v553_v24, %v549_v52  ;;  %v656_v10 = vadd.f32 %v654_v53, %v1987_v57  ;;  %p1361_p1 = pneg %p1360_p11 }
 0x17f   : > { %v2263_v9 = vadd.f32 %v2037_v14, %v556_v21  ;;  %v2266_v62 = vadd.f32 %v500_v44, %v496_v46  ;;  %v608_v61 = vadd.f32 %v606_v8, %v602_v50  ;;  %v655_v35 = vadd.f32 %v653_v18, %v649_v4 }
 0x180   : > { %v609_v23 = vadd.f32 %v607_v26, %v603_v25  ;;  %v2956_v30 = vstv %s1805_s4  ;;  %v2271_v37 = vadd.f32 %v559_v47, %v555_v58  ;;  %v702_v53 = vadd.f32 %v2017_v13, %v1947_v2  ;;  %s2964_s4 = sld [smem:[#allocation70_spill]]  ;;  %v2975_v58 = vld [vmem:[#allocation78_spill] sm:$0xff] }
 0x181   : > { %v659_v40 = vmul.f32 %v2956_v30, %v2075_v16  ;;  %v2958_v12 = vmov %v2956_v30  ;;  %v2281_v44 = vadd.f32 %v612_v48, %v608_v61  ;;  %v709_v18 = vadd.f32 %v2081_v51, %v1989_v56  ;;  %v2977_v61 = vld [vmem:[#allocation80_spill] sm:$0xff] }
 0x182   : > { %v2274_v3 = vadd.f32 %v2041_v31, %v609_v23  ;;  %v660_v14 = vmul.f32 %v2063_v22, %v2958_v12  ;;  %v2959_v7 = vstv %s2852_s6  ;;  %v708_v42 = vadd.f32 %v706_v41, %v702_v53  ;;  %s2973_s6 = sld [smem:[#allocation75_spill]]  ;;  %v2980_v12 = vld [vmem:[#allocation86_spill] sm:$0xff] }
 0x183   : > { %v661_v57 = vadd.f32 %v659_v40, %v655_v35  ;;  %v712_v36 = vmul.f32 %v2959_v7, %v2075_v16  ;;  %v2961_v31 = vmov %v2959_v7  ;;  %v755_v6 = vadd.f32 %v2021_v27, %v1951_v15 }
 0x184   : > { %v662_v47 = vadd.f32 %v660_v14, %v656_v10  ;;  %v713_v24 = vmul.f32 %v2063_v22, %v2961_v31  ;;  %v762_v2 = vadd.f32 %v2085_v43, %v1991_v55  ;;  %v2962_v51 = vstv %s2957_s1  ;;  %s1362_s1 = sshll.u32 %s1455_s0, 4  ;;  %s1363_s1 = int_to_ptr.vmem [resolvable:$false] %s1362_s1 }
 0x185   : > { %v2294_v48 = vadd.f32 %v2107_v49, %v661_v57  ;;  %v765_v56 = vmul.f32 %v2962_v51, %v2075_v16  ;;  %v2963_v13 = vmov %v2962_v51  ;;  %v714_v60 = vadd.f32 %v712_v36, %v708_v42  ;;  %v2987_v51 = vld [vmem:[#allocation79_spill] sm:$0xff]  ;;  %p1365_p0 = scmp.lt.s32.totalorder %s2563_s22, %s1363_s1 }
 0x186   : > { %v766_v11 = vmul.f32 %v2063_v22, %v2963_v13  ;;  %v2305_v41 = vadd.f32 %v2045_v32, %v662_v47  ;;  %v715_v25 = vadd.f32 %v713_v24, %v709_v18  ;;  %v761_v15 = vadd.f32 %v2141_v63, %v755_v6  ;;  %v2983_v47 = vld [vmem:[#allocation81_spill] sm:$0xff] }
 0x187   : > { %v808_v27 = vadd.f32 %v2025_v28, %v1955_v19  ;;  %v815_v43 = vadd.f32 %v2089_v45, %v1993_v54  ;;  %v2965_v55 = vstv %s2960_s19  ;;  %v2316_v32 = vadd.f32 %v2112_v1, %v714_v60  ;;  %v2968_v28 = vld [vmem:[#allocation84_spill] sm:$0xff]  ;;  %s1364_s19 = scalar_lea.vmem %s1363_s1, 4096 }
 0x188   : > { %v768_v49 = vadd.f32 %v766_v11, %v762_v2  ;;  %v818_v52 = vmul.f32 %v2965_v55, %v2075_v16  ;;  %v2319_v21 = vadd.f32 %v2049_v33, %v715_v25  ;;  %v767_v63 = vadd.f32 %v765_v56, %v761_v15  ;;  %v2969_v33 = vld [vmem:[#allocation85_spill] sm:$0xff]  ;;  %v2989_v11 = vld [vmem:[#allocation87_spill] sm:$0xff]  ;;  %p1366_p8 = scmp.lt.s32.totalorder %s1364_s19, %s1358_s10 }
 0x189   : > { %v2967_v5 = vmov %v2965_v55  ;;  %v814_v45 = vadd.f32 %v2145_v17, %v808_v27  ;;  %v861_v54 = vadd.f32 %v2029_v29, %v1959_v20  ;;  %v868_v1 = vadd.f32 %v2968_v28, %v1995_v0 }
 0x18a   : > { %v819_v8 = vmul.f32 %v2063_v22, %v2967_v5  ;;  %v2325_v19 = vadd.f32 %v2053_v34, %v768_v49  ;;  %v2333_v59 = vadd.f32 %v2969_v33, %v767_v63  ;;  %v2970_v46 = vstv %s2964_s4  ;;  %v2998_v33 = vld [vmem:[#allocation96_spill] sm:$0xff]  ;;  %p1367_p12 = por %p1366_p8, %p1365_p0 }
 0x18b   : > { %v871_v50 = vmul.f32 %v2970_v46, %v2075_v16  ;;  %v2972_v34 = vmov %v2970_v46  ;;  %v820_v4 = vadd.f32 %v818_v52, %v814_v45  ;;  %v867_v20 = vadd.f32 %v2149_v39, %v861_v54  ;;  %v3000_v46 = vld [vmem:[#allocation88_spill] sm:$0xff] }
 0x18c   : > { %v821_v26 = vadd.f32 %v819_v8, %v815_v43  ;;  %v872_v17 = vmul.f32 %v2063_v22, %v2972_v34  ;;  %v2974_v29 = vstv %s2966_s26  ;;  %v2976_v23 = vstv %s1821_s2  ;;  %s2999_s2 = sld [smem:[#allocation57_spill]]  ;;  %v3001_v34 = vld [vmem:[#allocation83_spill] sm:$0xff]  ;;  %p1368_p5 = pnand %p1367_p12, %p1361_p1 }
 0x18d   : > { %v513_v0 = vmul.f32 %v2975_v58, %v2974_v29  ;;  %v572_v10 = vmul.f32 %v2975_v58, %v2976_v23  ;;  %v2978_v30 = vstv %s1827_s12  ;;  %v2979_v40 = vstv %s1829_s25  ;;  %s3011_s25 = sld [smem:[#allocation106_spill]] }
 0x18e   : > { %v2349_v35 = vadd.f32 %v2977_v61, %v821_v26  ;;  %v874_v16 = vadd.f32 %v872_v17, %v868_v1  ;;  %v625_v22 = vmul.f32 %v2975_v58, %v2978_v30  ;;  %v678_v39 = vmul.f32 %v2975_v58, %v2979_v40 }
 0x18f   : > { %v2358_v14 = vadd.f32 %v2980_v12, %v820_v4  ;;  %v873_v53 = vadd.f32 %v871_v50, %v867_v20  ;;  %v2981_v57 = vstv %s2856_s24  ;;  %v2982_v7 = vstv %s2857_s29  ;;  %s3016_s29 = sld [smem:[#allocation58_spill]] }
 0x190   : > { %v2363_v18 = vmul.f32 %v2975_v58, %v2981_v57  ;;  %v2368_v36 = vmul.f32 %v2975_v58, %v2982_v7  ;;  %v2371_v42 = vadd.f32 %v2983_v47, %v874_v16  ;;  %v2985_v31 = vstv %s2971_s7  ;;  %v3006_v16 = vld [vmem:[#allocation89_spill] sm:$0xff] }
 0x191   : > { %v2376_v24 = vmul.f32 %v2975_v58, %v2985_v31  ;;  %v2986_v6 = vstv %s2973_s6  ;;  %v2988_v56 = vmov %v2974_v29  ;;  %v2387_v60 = vadd.f32 %v2989_v11, %v873_v53  ;;  %v3004_v29 = vld [vmem:[#allocation82_spill] sm:$0xff] }
 0x192   : > { %v2381_v2 = vmul.f32 %v2975_v58, %v2986_v6  ;;  %v512_v13 = vmul.f32 %v2988_v56, %v2987_v51  ;;  %v2991_v25 = vmov %v2976_v23  ;;  %v2992_v49 = vmov %v2978_v30  ;;  %v3005_v23 = vld [vmem:[#allocation97_spill] sm:$0xff] }
 0x193   : > { %v571_v15 = vmul.f32 %v2991_v25, %v2987_v51  ;;  %v624_v27 = vmul.f32 %v2992_v49, %v2987_v51  ;;  %v2993_v43 = vmov %v2979_v40  ;;  %v2994_v52 = vmov %v2981_v57 }
 0x194   : > { %v677_v55 = vmul.f32 %v2993_v43, %v2987_v51  ;;  %v730_v63 = vmul.f32 %v2994_v52, %v2987_v51  ;;  %v2995_v5 = vmov %v2982_v7  ;;  %v2996_v45 = vmov %v2985_v31  ;;  %v3009_v7 = vld [vmem:[#allocation98_spill] sm:$0xff] }
 0x195   : > { %v2404_v8 = vmul.f32 %v2995_v5, %v2987_v51  ;;  %v2409_v54 = vmul.f32 %v2996_v45, %v2987_v51  ;;  %v2997_v28 = vmov %v2986_v6  ;;  %v508_v26 = vadd.f32 %v2998_v33, %v2266_v62  ;;  %v3010_v31 = vld [vmem:[#allocation90_spill] sm:$0xff] }
 0x196   : > { %v2414_v1 = vmul.f32 %v2997_v28, %v2987_v51  ;;  %v509_v50 = vadd.f32 %v3000_v46, %v2258_v38  ;;  %v3002_v17 = vstv %s2984_s30  ;;  %v567_v61 = vadd.f32 %v3005_v23, %v2271_v37  ;;  %v2443_v37 = vld [vmem:[%s3011_s25] ss:$0 sm:$0xff]  ;;  %v3015_v28 = vld [vmem:[#allocation91_spill] sm:$0xff] }
 0x197   : > { %v518_v4 = vmul.f32 %v3002_v17, %v3001_v34  ;;  %v3003_v20 = vmov %v3002_v17  ;;  %v568_v30 = vadd.f32 %v3006_v16, %v2263_v9  ;;  %v3007_v40 = vstv %s2990_s17 }
 0x198   : > { %v519_v58 = vmul.f32 %v3004_v29, %v3003_v20  ;;  %v577_v12 = vmul.f32 %v3007_v40, %v3001_v34  ;;  %v3008_v62 = vmov %v3007_v40  ;;  %v514_v57 = vadd.f32 %v512_v13, %v508_v26 }
 0x199   : > { %v578_v53 = vmul.f32 %v3004_v29, %v3008_v62  ;;  %v515_v38 = vadd.f32 %v513_v0, %v509_v50  ;;  %v620_v47 = vadd.f32 %v3009_v7, %v2281_v44  ;;  %v621_v6 = vadd.f32 %v3010_v31, %v2274_v3  ;;  %v3014_v3 = vld [vmem:[#allocation99_spill] sm:$0xff] }
 0x19a   : > { %v573_v9 = vadd.f32 %v571_v15, %v567_v61  ;;  %v574_v51 = vadd.f32 %v572_v10, %v568_v30  ;;  %v3012_v56 = vstv %s2999_s2  ;;  %v520_v0 = vadd.f32 %v518_v4, %v514_v57 }
 0x19b   : > { %v630_v11 = vmul.f32 %v3012_v56, %v3001_v34  ;;  %v3013_v25 = vmov %v3012_v56  ;;  %v521_v49 = vadd.f32 %v519_v58, %v515_v38  ;;  %v626_v43 = vadd.f32 %v624_v27, %v620_v47 }
 0x19c   : > { %v631_v13 = vmul.f32 %v3004_v29, %v3013_v25  ;;  %v627_v44 = vadd.f32 %v625_v22, %v621_v6  ;;  %v579_v52 = vadd.f32 %v577_v12, %v573_v9  ;;  %v580_v5 = vadd.f32 %v578_v53, %v574_v51  ;;  %v3022_v12 = vld [vmem:[#allocation100_spill] sm:$0xff]  ;;  %v3027_v51 = vld [vmem:[#allocation101_spill] sm:$0xff] }
 0x19d   : > { %v673_v45 = vadd.f32 %v3014_v3, %v2294_v48  ;;  %v674_v15 = vadd.f32 %v3015_v28, %v2305_v41  ;;  %v528_v10 = vadd.f32 %v2443_v37, %v520_v0  ;;  %v529_v33 = vadd.f32 %v2443_v37, %v521_v49  ;;  %v3023_v53 = vld [vmem:[#allocation92_spill] sm:$0xff] }
 0x19e   : > { %v632_v26 = vadd.f32 %v630_v11, %v626_v43  ;;  %v633_v46 = vadd.f32 %v631_v13, %v627_v44  ;;  %v581_v27 = vadd.f32 %v2443_v37, %v579_v52  ;;  %v582_v22 = vadd.f32 %v2443_v37, %v580_v5  ;;  %v3028_v11 = vld [vmem:[#allocation93_spill] sm:$0xff] }
 0x19f   : > { %v679_v50 = vadd.f32 %v677_v55, %v673_v45  ;;  %v680_v17 = vadd.f32 %v678_v39, %v674_v15  ;;  %v530_v4 = vmax.f32 %v528_v10, 0.0  ;;  %v531_v48 = vmax.f32 %v529_v33, 0.0  ;;  %v3032_v45 = vld [vmem:[#allocation102_spill] sm:$0xff] }
 0x1a0   : > { %v634_v20 = vadd.f32 %v2443_v37, %v632_v26  ;;  %v635_v41 = vadd.f32 %v2443_v37, %v633_v46  ;;  %v583_v58 = vmax.f32 %v581_v27, 0.0  ;;  %v584_v23 = vmax.f32 %v582_v22, 0.0  ;;  %v3033_v15 = vld [vmem:[#allocation94_spill] sm:$0xff] }
 0x1a1   : > { %v3019_v61 = vstv %s3016_s29  ;;  %533 = vst.msk [vmem:[%s2469_s23] sm:$0xff] %vm532_vm1, %v530_v4  ;;  %534 = vst.msk [vmem:[%s2469_s23 + $0x8] sm:$0xff] %vm532_vm1, %v531_v48  ;;  %v726_v62 = vadd.f32 %v3022_v12, %v2316_v32  ;;  %v727_v57 = vadd.f32 %v3023_v53, %v2319_v21  ;;  %v3025_v47 = vstv %s3018_s20 }
 0x1a2   : > { %v683_v16 = vmul.f32 %v3019_v61, %v3001_v34  ;;  %v3020_v30 = vmov %v3019_v61  ;;  %v636_v39 = vmax.f32 %v634_v20, 0.0  ;;  %v637_v55 = vmax.f32 %v635_v41, 0.0  ;;  %1079 = vst.msk [vmem:[%s2469_s23 + $0x10] sm:$0xff] %vm532_vm1, %v583_v58  ;;  %1080 = vst.msk [vmem:[%s2469_s23 + $0x18] sm:$0xff] %vm532_vm1, %v584_v23  ;;  %v3037_v58 = vld [vmem:[#allocation103_spill] sm:$0xff] }
 0x1a3   : > { %v684_v40 = vmul.f32 %v3004_v29, %v3020_v30  ;;  %v736_v31 = vmul.f32 %v3025_v47, %v3001_v34  ;;  %v3026_v6 = vmov %v3025_v47  ;;  %v732_v32 = vadd.f32 %v730_v63, %v726_v62  ;;  %v3038_v23 = vld [vmem:[#allocation95_spill] sm:$0xff] }
 0x1a4   : > { %v685_v38 = vadd.f32 %v683_v16, %v679_v50  ;;  %v737_v9 = vmul.f32 %v3004_v29, %v3026_v6  ;;  %1089 = vst.msk [vmem:[%s2469_s23 + $0x20] sm:$0xff] %vm532_vm1, %v636_v39  ;;  %1090 = vst.msk [vmem:[%s2469_s23 + $0x28] sm:$0xff] %vm532_vm1, %v637_v55  ;;  %v733_v21 = vadd.f32 %v2363_v18, %v727_v57  ;;  %v3029_v49 = vstv %s3024_s8 }
 0x1a5   : > { %v686_v7 = vadd.f32 %v684_v40, %v680_v17  ;;  %v779_v56 = vadd.f32 %v3027_v51, %v2333_v59  ;;  %v780_v25 = vadd.f32 %v3028_v11, %v2325_v19  ;;  %v789_v43 = vmul.f32 %v3029_v49, %v3001_v34 }
 0x1a6   : > { %v687_v13 = vadd.f32 %v2443_v37, %v685_v38  ;;  %v3030_v44 = vmov %v3029_v49  ;;  %v738_v52 = vadd.f32 %v736_v31, %v732_v32  ;;  %v739_v18 = vadd.f32 %v737_v9, %v733_v21 }
 0x1a7   : > { %v688_v0 = vadd.f32 %v2443_v37, %v686_v7  ;;  %v790_v63 = vmul.f32 %v3004_v29, %v3030_v44  ;;  %v785_v59 = vadd.f32 %v2404_v8, %v779_v56  ;;  %v786_v19 = vadd.f32 %v2368_v36, %v780_v25 }
 0x1a8   : > { %v689_v5 = vmax.f32 %v687_v13, 0.0  ;;  %v832_v28 = vadd.f32 %v3032_v45, %v2358_v14  ;;  %v833_v10 = vadd.f32 %v3033_v15, %v2349_v35  ;;  %v740_v33 = vadd.f32 %v2443_v37, %v738_v52 }
 0x1a9   : > { %v690_v3 = vmax.f32 %v688_v0, 0.0  ;;  %v741_v26 = vadd.f32 %v2443_v37, %v739_v18  ;;  %v791_v46 = vadd.f32 %v789_v43, %v785_v59  ;;  %v792_v27 = vadd.f32 %v790_v63, %v786_v19 }
 0x1aa   : > { %1099 = vst.msk [vmem:[%s2469_s23 + $0x30] sm:$0xff] %vm532_vm1, %v689_v5  ;;  %v838_v36 = vadd.f32 %v2409_v54, %v832_v28  ;;  %v839_v14 = vadd.f32 %v2376_v24, %v833_v10  ;;  %v3035_v8 = vstv %s3031_s14  ;;  %v742_v17 = vmax.f32 %v740_v33, 0.0 }
 0x1ab   : > { %1100 = vst.msk [vmem:[%s2469_s23 + $0x38] sm:$0xff] %vm532_vm1, %v690_v3  ;;  %v842_v35 = vmul.f32 %v3035_v8, %v3001_v34  ;;  %v3036_v22 = vmov %v3035_v8  ;;  %v743_v4 = vmax.f32 %v741_v26, 0.0  ;;  %v793_v48 = vadd.f32 %v2443_v37, %v791_v46 }
 0x1ac   : > { %v843_v50 = vmul.f32 %v3004_v29, %v3036_v22  ;;  %v794_v20 = vadd.f32 %v2443_v37, %v792_v27  ;;  %v885_v24 = vadd.f32 %v3037_v58, %v2387_v60  ;;  %v886_v61 = vadd.f32 %v3038_v23, %v2371_v42  ;;  %1109 = vst.msk [vmem:[%s2469_s23 + $0x40] sm:$0xff] %vm532_vm1, %v742_v17 }
 0x1ad   : > { %v844_v41 = vadd.f32 %v842_v35, %v838_v36  ;;  %1110 = vst.msk [vmem:[%s2469_s23 + $0x48] sm:$0xff] %vm532_vm1, %v743_v4  ;;  %v795_v16 = vmax.f32 %v793_v48, 0.0  ;;  %v3040_v40 = vstv %s3034_s21 }
 0x1ae   : > { %v845_v54 = vadd.f32 %v843_v50, %v839_v14  ;;  %v796_v30 = vmax.f32 %v794_v20, 0.0  ;;  %v895_v39 = vmul.f32 %v3040_v40, %v3001_v34  ;;  %v3041_v55 = vmov %v3040_v40 }
 0x1af   : > { %v896_v12 = vmul.f32 %v3004_v29, %v3041_v55  ;;  %v846_v60 = vadd.f32 %v2443_v37, %v844_v41  ;;  %v891_v62 = vadd.f32 %v2414_v1, %v885_v24  ;;  %v892_v53 = vadd.f32 %v2381_v2, %v886_v61  ;;  %1119 = vst.msk [vmem:[%s2469_s23 + $0x50] sm:$0xff] %vm532_vm1, %v795_v16 }
 0x1b0   : > { %v847_v42 = vadd.f32 %v2443_v37, %v845_v54  ;;  %1120 = vst.msk [vmem:[%s2469_s23 + $0x58] sm:$0xff] %vm532_vm1, %v796_v30 }
 0x1b1   : > { %v848_v57 = vmax.f32 %v846_v60, 0.0  ;;  %v897_v38 = vadd.f32 %v895_v39, %v891_v62  ;;  %v898_v7 = vadd.f32 %v896_v12, %v892_v53 }
 0x1b2   : > { %v849_v34 = vmax.f32 %v847_v42, 0.0 }
 0x1b3   : > { %1129 = vst.msk [vmem:[%s2469_s23 + $0x60] sm:$0xff] %vm532_vm1, %v848_v57  ;;  %v899_v2 = vadd.f32 %v2443_v37, %v897_v38  ;;  %v900_v1 = vadd.f32 %v2443_v37, %v898_v7 }
 0x1b4   : > { %1130 = vst.msk [vmem:[%s2469_s23 + $0x68] sm:$0xff] %vm532_vm1, %v849_v34 }
 0x1b5   : > { %v901_v29 = vmax.f32 %v899_v2, 0.0  ;;  %v902_v47 = vmax.f32 %v900_v1, 0.0 }
 0x1b7   : > { %1139 = vst.msk [vmem:[%s2469_s23 + $0x70] sm:$0xff] %vm532_vm1, %v901_v29  ;;  %1140 = vst.msk [vmem:[%s2469_s23 + $0x78] sm:$0xff] %vm532_vm1, %v902_v47 }
 0x1b8   : > { %1371 = shalt.err (!%p1368_p5)
}
 0x1b9   : > { %s1372_s4 = scalar_lea.hbm %s2561_s9, 2048  ;;  %s1376_s6 = scalar_lea.hbm %s3043_s13, 4096 }
 0x1ba   : > { %p1373_p3 = scmp.ne.s32.totalorder %s2561_s9, %s1372_s4  ;;  %p1377_p13 = scmp.lt.u32.totalorder %s2561_s9, %s3043_s13 }
 0x1bb   : > { %p1378_p2 = scmp.lt.u32.totalorder %s1376_s6, %s1372_s4  ;;  %p1380_p9 = scmp.lt.u32.totalorder %s1372_s4, %s2561_s9 }
 0x1bc   : > { %p1374_p6 = pnand %p1373_p3, %p3044_p4 }
 0x1bd   : > { %p1379_p7 = por %p1378_p2, %p1377_p13 }
 0x1be   : > { %p1375_p10 = pneg %p1374_p6 }
 0x1bf   : > { %p1381_p11 = por %p1380_p9, %p1379_p7 }
 0x1c1   : > { %p1382_p1 = pnand %p1381_p11, %p1375_p10 }
 0x1c3   : > { %1385 = shalt.err (!%p1382_p1)
}
 0x1c4   : > { %s1456_s2 = smov 128   ;;  %s1457_s12 = smov 8  }
 0x1c5   : > { %1210 = dma.vmem_to_hbm [thread:$0]  (%p3044_p4), %s2563_s22, 2048, %s2561_s9, %s907_s28, %s1456_s2, %s1456_s2, %s1457_s12  }
 0x1c6 PF: > { %s3045_s24 = sld [smem:[#allocation14_spill]]  ;;  %s3046_s25 = sld [smem:[#allocation21_spill]] }
 0x1c7   : > { %s3047_s29 = sld [smem:[#allocation19_spill]] }
 0x1cc   : > { %s937_s20 = sand.u32 1, %s3045_s24   ;;  %p3048_p0 = scmp.ne.s32.totalorder %s3046_s25, 0 }
 0x1cd   : > { %p3049_p8 = scmp.ge.s32.totalorder %s3047_s29, 2  ;;  %s938_s27 = scalar_lea.sflag [#allocation4], %s937_s20 }
 0x1cf   : > { %p1224_p12 = pnand %p3049_p8, %p3048_p0 }
 0x1d1   : > { %1423 = dma.done.wait (!%p1224_p12), %s938_s27, 2048  }
 0x1d2   : > { %1425 = vsyncadd (!%p1224_p12), %s938_s27, 4294965248  ;;  %s22_s20 = sadd.s32 1, %s3047_s29   ;;  %s3050_s15 = sld [smem:[#allocation15_spill]] }
 0x1d3   : > { %p19_p5 = scmp.ge.s32.totalorder %s22_s20, 4   ;;  %s3051_s16 = sld [smem:[#allocation16_spill]] }
 0x1d4   : > { %s3052_s17 = sld [smem:[#allocation23_spill]]  ;;  %s3053_s18 = sld [smem:[#allocation18_spill]] }
 0x1d5   : > { %s3054_s19 = sld [smem:[#allocation22_spill]]  ;;  %21 = sbr.rel (!%p19_p5) target bundleno = 14 (0xe), region = 98 }
 0x1dc   :  { %943 = vsyncpa [#allocation3], 1 }
 0x1dd   :  { %945 = vsyncpa [#allocation3 + $0x1], 1 }
 0x1de   :  { %946 = vsyncpa [#allocation8], 1 }
 0x1df   :  { %948 = vsyncpa [#allocation8 + $0x1], 1 }
 0x1e0   :  { %949 = vsyncpa [#allocation4], 1 }
 0x1e1   :  { %951 = vsyncpa [#allocation4 + $0x1], 1 }
 0x1e2   :  { %952 = vsyncpa [#allocation5], 1 }
 0x1e3   :  { %954 = vsyncpa [#allocation5 + $0x1], 1 }

</bundles_post_ra>
